<compile_context>
chip_gen: v7x
topology: tpu7x:2x2x1
jax: 0.10.0
libtpu: 0.0.40
codegen_flags: <defaults>
</compile_context>

<pallas_src>
import numpy as np
import jax
import jax.numpy as jnp
from jax.experimental import pallas as pl
from jax.experimental.pallas import tpu as pltpu

MXU_DTYPE = jnp.bfloat16      # matmul operand dtype (accumulation is f32)

_C1, _C2 = 6, 16              # conv channel counts
_H1, _W1 = 24, 24             # conv1 output spatial
_H2, _W2 = 8, 8               # conv2 output spatial
_K = 5                        # conv kernel size

# conv1 output rows ordered [0,2,...,22, 1,3,...,23] so the 2x2 row pooling is
# an add of two contiguous halves inside the kernel.
_ROWPERM = np.array([2 * i for i in range(_H1 // 2)]
                    + [2 * i + 1 for i in range(_H1 // 2)], np.int32)     # (24,)
_ROWIDX = (_ROWPERM[:, None] + np.arange(_K)[None, :]).reshape(-1)        # (120,)


# ------------------------------ Pallas kernel ------------------------------ #

def _lenet5_kernel(xb_ref, w1_ref, b1_ref, w2_ref, b2_ref, u_ref, fb1_ref,
                   w3_ref, b3_ref, w4_ref, b4_ref, out_ref):
    bt = xb_ref.shape[0]
    f32 = jnp.float32

    # ---- conv1 (1->6, k=5) + bias + ReLU ----
    # Batch collapsed into M; the 5 kernel rows were concatenated along K by
    # the wrapper, so the whole conv is ONE (Bt*24, 140) @ (140, 144) matmul.
    lhs1 = xb_ref[...].reshape(bt * _H1, _K * 28)                       # bf16
    y1 = jnp.dot(lhs1, w1_ref[...], preferred_element_type=f32)
    y1 = jnp.maximum(y1 + b1_ref[...], 0.0).reshape(bt, _H1, _W1 * _C1)

    # ---- pool1 (rows): even/odd conv rows are the two contiguous halves ----
    # (width half of the pool is folded into the conv2 weights below)
    s1 = ((y1[:, :_H1 // 2, :] + y1[:, _H1 // 2:, :]) * 0.5).astype(MXU_DTYPE)

    # ---- conv2 (6->16, k=5) + bias + ReLU ----
    # 5 banded matmuls, K=144 each (pool1 width folded in), batch in M,
    # f32 accumulation: (Bt*8, 144) @ (144, 128) per band.
    acc = jnp.dot(s1[:, 0:_H2, :].reshape(bt * _H2, _W1 * _C1), w2_ref[0],
                  preferred_element_type=f32)
    for di in range(1, _K):
        acc = acc + jnp.dot(s1[:, di:di + _H2, :].reshape(bt * _H2, _W1 * _C1),
                            w2_ref[di], preferred_element_type=f32)
    y2 = jnp.maximum(acc + b2_ref[...], 0.0)
    y2 = y2.reshape(bt, _H2, _W2 * _C2).astype(MXU_DTYPE)

    # ---- fc1 (256->120): the whole 2x2 pool2 is folded into U (8,128,120) ----
    h = jnp.dot(y2[:, 0, :], u_ref[0], preferred_element_type=f32)
    for r in range(1, _H2):
        h = h + jnp.dot(y2[:, r, :], u_ref[r], preferred_element_type=f32)
    h = jnp.maximum(h + fb1_ref[...], 0.0)                              # (Bt,120)

    # ---- fc2 (120->84) + ReLU, fc3 (84->10, padded to 128 lanes) ----
    h = jnp.maximum(jnp.dot(h.astype(MXU_DTYPE), w3_ref[...],
                            preferred_element_type=f32) + b3_ref[...], 0.0)
    out = jnp.dot(h.astype(MXU_DTYPE), w4_ref[...],
                  preferred_element_type=f32) + b4_ref[...]             # (Bt,128)
    out_ref[...] = out.astype(out_ref.dtype)


# ------------------------------- wrappers ----------------------------------- #

def _lenet5_pallas_call(xb, consts, block_b):
    bpad = xb.shape[0]
    grid = (bpad // block_b,)

    def const_spec(c):
        nd = c.ndim
        return pl.BlockSpec(c.shape, lambda i, _nd=nd: (0,) * _nd)

    in_specs = [pl.BlockSpec((block_b, _H1, _K * 28), lambda i: (i, 0, 0))]
    in_specs += [const_spec(c) for c in consts]

    flops = 2 * bpad * (_H1 * (_K * 28) * (_W1 * _C1)
                        + _K * _H2 * (_W1 * _C1) * (_W2 * _C2)
                        + _H2 * (_W2 * _C2) * 120 + 120 * 84 + 84 * 128)
    const_bytes = sum(int(c.size) * c.dtype.itemsize for c in consts)
    bytes_accessed = int(xb.size) * xb.dtype.itemsize + bpad * 128 * 4 + const_bytes

    return pl.pallas_call(
        _lenet5_kernel,
        out_shape=jax.ShapeDtypeStruct((bpad, 128), jnp.float32),
        grid=grid,
        in_specs=in_specs,
        out_specs=pl.BlockSpec((block_b, 128), lambda i: (i, 0)),
        compiler_params=pltpu.CompilerParams(
            dimension_semantics=("parallel",),
            vmem_limit_bytes=48 * 1024 * 1024,
        ),
        cost_estimate=pl.CostEstimate(flops=flops, transcendentals=0,
                                      bytes_accessed=bytes_accessed),
    )(xb, *consts)


def lenet5_forward(x, consts, block_b=128):
    """x: (B, 1, 28, 28) NCHW (PyTorch layout) or (B, 28, 28) -> (B, 10)."""
    if x.ndim == 4:
        x = x[:, 0]
    b = x.shape[0]
    # Row-band unfold + even/odd row permutation (tiny, done by XLA once):
    # xb[b, p, di*28 + c] = x[b, ROWPERM[p] + di, c]  -> (B, 24, 140)
    xb = x[:, _ROWIDX, :].reshape(b, _H1, _K * 28).astype(MXU_DTYPE)
    bb = min(block_b, ((b + 7) // 8) * 8)          # batch tile (<= block_b)
    bpad = ((b + bb - 1) // bb) * bb
    xb = jnp.pad(xb, ((0, bpad - b), (0, 0), (0, 0)))
    out = _lenet5_pallas_call(xb, consts, bb)
    return out[:b, :10]


def build_constants(params):
    """Re-pack PyTorch-layout LeNet-5 params into the kernel's fused layout."""
    (w1, b1, w2, b2, fw1, fb1, fw2, fb2, fw3, fb3) = [
        np.asarray(p, np.float32) for p in params]

    # conv1 as one (140, 144) matrix: K = (kernel row di, input col),
    # N lane layout = out_col j * 6 + out_chan o.
    w1cat = np.zeros((_K * 28, _W1 * _C1), np.float32)
    for di in range(_K):
        for dj in range(_K):
            for j in range(_W1):
                w1cat[di * 28 + j + dj, j * _C1:(j + 1) * _C1] = w1[:, 0, di, dj]
    bias1 = np.tile(b1, _W1).reshape(1, _W1 * _C1)

    # conv2 bands on width-pooled input (72 -> 128) ...
    band2 = np.zeros((_K, 12 * _C1, _W2 * _C2), np.float32)
    for di in range(_K):
        for dj in range(_K):
            for j in range(_W2):
                for c in range(_C1):
                    band2[di, (j + dj) * _C1 + c, j * _C2:(j + 1) * _C2] = w2[:, c, di, dj]
    # ... then fold the width half of pool1 (144 -> 72) into the bands (K=144).
    pw1 = np.zeros((_W1 * _C1, 12 * _C1), np.float32)
    for u in range(12):
        for ch in range(_C1):
            pw1[(2 * u) * _C1 + ch, u * _C1 + ch] = 0.5
            pw1[(2 * u + 1) * _C1 + ch, u * _C1 + ch] = 0.5
    band2f = np.einsum('kp,dpn->dkn', pw1, band2)            # (5, 144, 128)
    bias2 = np.tile(b2, _W2).reshape(1, _W2 * _C2)

    # fc1: PyTorch flatten order f = o*16 + p*4 + u ; our lane order = u*16 + o.
    V = (fw1.T.reshape(_C2, 4, 4, 120).transpose(1, 2, 0, 3)
         .reshape(4, 4 * _C2, 120))                          # (4, 64, 120)
    # Fold the width half of pool2 (128 -> 64) ...
    pw2 = np.zeros((_W2 * _C2, 4 * _C2), np.float32)
    for u in range(4):
        for ch in range(_C2):
            pw2[(2 * u) * _C2 + ch, u * _C2 + ch] = 0.5
            pw2[(2 * u + 1) * _C2 + ch, u * _C2 + ch] = 0.5
    Vp = np.einsum('kp,hpn->hkn', pw2, V)                    # (4, 128, 120)
    # ... and the row half (conv2 rows r = 2p, 2p+1 each contribute 0.5*Vp[p]).
    U = 0.5 * Vp[np.arange(_H2) // 2]                        # (8, 128, 120)

    # fc3 zero-padded to 128 lane-dense output columns.
    fw3p = np.zeros((84, 128), np.float32)
    fw3p[:, :10] = fw3.T
    fb3p = np.zeros((1, 128), np.float32)
    fb3p[0, :10] = fb3

    mx = MXU_DTYPE
    return (
        jnp.asarray(w1cat, mx), jnp.asarray(bias1, jnp.float32),
        jnp.asarray(band2f, mx), jnp.asarray(bias2, jnp.float32),
        jnp.asarray(U, mx), jnp.asarray(fb1.reshape(1, 120), jnp.float32),
        jnp.asarray(fw2.T, mx), jnp.asarray(fb2.reshape(1, 84), jnp.float32),
        jnp.asarray(fw3p, mx), jnp.asarray(fb3p, jnp.float32),
    )


# ------------------------- reference & param init --------------------------- #

def init_params(key):
    """Parameters in PyTorch layout: conv (O,I,kh,kw), linear (out,in)."""
    ks = jax.random.split(key, 10)
    s = 0.1
    return (
        jax.random.normal(ks[0], (6, 1, 5, 5), jnp.float32) * s,
        jax.random.normal(ks[1], (6,), jnp.float32) * s,
        jax.random.normal(ks[2], (16, 6, 5, 5), jnp.float32) * s,
        jax.random.normal(ks[3], (16,), jnp.float32) * s,
        jax.random.normal(ks[4], (120, 256), jnp.float32) * s,
        jax.random.normal(ks[5], (120,), jnp.float32) * s,
        jax.random.normal(ks[6], (84, 120), jnp.float32) * s,
        jax.random.normal(ks[7], (84,), jnp.float32) * s,
        jax.random.normal(ks[8], (10, 84), jnp.float32) * s,
        jax.random.normal(ks[9], (10,), jnp.float32) * s,
    )


def lenet5_reference(x, params):
    (w1, b1, w2, b2, fw1, fb1, fw2, fb2, fw3, fb3) = params
    dn = ("NCHW", "OIHW", "NCHW")
    y = jax.lax.conv_general_dilated(x, w1, (1, 1), "VALID", dimension_numbers=dn)
    y = jax.nn.relu(y + b1.reshape(1, -1, 1, 1))
    B, C, H, W = y.shape
    y = y.reshape(B, C, H // 2, 2, W // 2, 2).mean(axis=(3, 5))
    y = jax.lax.conv_general_dilated(y, w2, (1, 1), "VALID", dimension_numbers=dn)
    y = jax.nn.relu(y + b2.reshape(1, -1, 1, 1))
    B, C, H, W = y.shape
    y = y.reshape(B, C, H // 2, 2, W // 2, 2).mean(axis=(3, 5))
    y = y.reshape(B, -1)
    y = jax.nn.relu(y @ fw1.T + fb1)
    y = jax.nn.relu(y @ fw2.T + fb2)
    return y @ fw3.T + fb3


if __name__ == "__main__":
    key = jax.random.PRNGKey(0)
    pkey, xkey = jax.random.split(key)
    params = init_params(pkey)
    consts = build_constants(params)

    fwd = jax.jit(lenet5_forward)

    # Small check (batch=2); LeNet-5 needs 1x28x28 inputs (FC expects 256 feats).
    x = jax.random.normal(xkey, (2, 1, 28, 28), jnp.float32)
    out = jax.block_until_ready(fwd(x, consts))
    assert out.shape == (2, 10) and out.dtype == jnp.float32
    err = float(jnp.max(jnp.abs(out - lenet5_reference(x, params))))
    assert err < 0.1, f"mismatch vs reference (batch=2): max abs err {err}"

    # A batch that exercises the 128-image tile and a 2-step "parallel" grid.
    x2 = jax.random.normal(jax.random.PRNGKey(1), (160, 1, 28, 28), jnp.float32)
    out2 = jax.block_until_ready(fwd(x2, consts))
    err2 = float(jnp.max(jnp.abs(out2 - lenet5_reference(x2, params))))
    assert err2 < 0.1, f"mismatch vs reference (batch=160): max abs err {err2}"

    print("KERNEL_OK")
</pallas_src>

<mosaic_0001>
module attributes {stable_mosaic.version = 11 : i64} {
  func.func @_lenet5_kernel(%arg0: i32, %arg1: memref<8x24x140xbf16, #tpu.memory_space<vmem>>, %arg2: memref<140x144xbf16, #tpu.memory_space<vmem>>, %arg3: memref<1x144xf32, #tpu.memory_space<vmem>>, %arg4: memref<5x144x128xbf16, #tpu.memory_space<vmem>>, %arg5: memref<1x128xf32, #tpu.memory_space<vmem>>, %arg6: memref<8x128x120xbf16, #tpu.memory_space<vmem>>, %arg7: memref<1x120xf32, #tpu.memory_space<vmem>>, %arg8: memref<120x84xbf16, #tpu.memory_space<vmem>>, %arg9: memref<1x84xf32, #tpu.memory_space<vmem>>, %arg10: memref<84x128xbf16, #tpu.memory_space<vmem>>, %arg11: memref<1x128xf32, #tpu.memory_space<vmem>>, %arg12: memref<8x128xf32, #tpu.memory_space<vmem>>) attributes {dimension_semantics = [#tpu.dimension_semantics<parallel>], iteration_bounds = array<i64: 1>, scalar_prefetch = 0 : i64, scratch_operands = 0 : i64, tpu.core_type = #tpu.core_type<tc>, window_params = [{transform_indices = @transform_0, window_bounds = array<i64: 8, 24, 140>}, {pipeline_mode = #tpu.pipeline_mode<synchronous>, transform_indices = @transform_1, window_bounds = array<i64: 140, 144>}, {pipeline_mode = #tpu.pipeline_mode<synchronous>, transform_indices = @transform_2, window_bounds = array<i64: 1, 144>}, {pipeline_mode = #tpu.pipeline_mode<synchronous>, transform_indices = @transform_3, window_bounds = array<i64: 5, 144, 128>}, {pipeline_mode = #tpu.pipeline_mode<synchronous>, transform_indices = @transform_4, window_bounds = array<i64: 1, 128>}, {pipeline_mode = #tpu.pipeline_mode<synchronous>, transform_indices = @transform_5, window_bounds = array<i64: 8, 128, 120>}, {pipeline_mode = #tpu.pipeline_mode<synchronous>, transform_indices = @transform_6, window_bounds = array<i64: 1, 120>}, {pipeline_mode = #tpu.pipeline_mode<synchronous>, transform_indices = @transform_7, window_bounds = array<i64: 120, 84>}, {pipeline_mode = #tpu.pipeline_mode<synchronous>, transform_indices = @transform_8, window_bounds = array<i64: 1, 84>}, {pipeline_mode = #tpu.pipeline_mode<synchronous>, transform_indices = @transform_9, window_bounds = array<i64: 84, 128>}, {pipeline_mode = #tpu.pipeline_mode<synchronous>, transform_indices = @transform_10, window_bounds = array<i64: 1, 128>}, {transform_indices = @transform_11, window_bounds = array<i64: 8, 128>}]} {
    %c0 = arith.constant 0 : index
    %c0_0 = arith.constant 0 : index
    %c0_1 = arith.constant 0 : index
    %0 = vector.load %arg1[%c0, %c0_0, %c0_1] : memref<8x24x140xbf16, #tpu.memory_space<vmem>>, vector<8x24x140xbf16>
    %1 = vector.shape_cast %0 : vector<8x24x140xbf16> to vector<192x140xbf16>
    %c0_2 = arith.constant 0 : index
    %c0_3 = arith.constant 0 : index
    %2 = vector.load %arg2[%c0_2, %c0_3] : memref<140x144xbf16, #tpu.memory_space<vmem>>, vector<140x144xbf16>
    %cst = arith.constant dense<0.000000e+00> : vector<192x144xf32>
    %3 = tpu.matmul %1, %2, %cst {dimension_numbers = #tpu.dot_dimension_numbers<[1], [0], [0], [1], [0, 0, 1, 1], [], []>} : vector<192x140xbf16>, vector<140x144xbf16>, vector<192x144xf32> -> vector<192x144xf32>
    %c0_4 = arith.constant 0 : index
    %c0_5 = arith.constant 0 : index
    %4 = vector.load %arg3[%c0_4, %c0_5] : memref<1x144xf32, #tpu.memory_space<vmem>>, vector<1x144xf32>
    %5 = vector.broadcast %4 : vector<1x144xf32> to vector<192x144xf32>
    %6 = arith.addf %3, %5 : vector<192x144xf32>
    %cst_6 = arith.constant 0.000000e+00 : f32
    %7 = vector.broadcast %cst_6 : f32 to vector<192x144xf32>
    %8 = arith.maximumf %6, %7 : vector<192x144xf32>
    %9 = vector.shape_cast %8 : vector<192x144xf32> to vector<8x24x144xf32>
    %10 = vector.extract_strided_slice %9 {offsets = [0, 0, 0], sizes = [8, 12, 144], strides = [1, 1, 1]} : vector<8x24x144xf32> to vector<8x12x144xf32>
    %11 = vector.extract_strided_slice %9 {offsets = [0, 12, 0], sizes = [8, 12, 144], strides = [1, 1, 1]} : vector<8x24x144xf32> to vector<8x12x144xf32>
    %12 = arith.addf %10, %11 : vector<8x12x144xf32>
    %cst_7 = arith.constant 5.000000e-01 : f32
    %13 = vector.broadcast %cst_7 : f32 to vector<8x12x144xf32>
    %14 = arith.mulf %12, %13 : vector<8x12x144xf32>
    %15 = arith.truncf %14 : vector<8x12x144xf32> to vector<8x12x144xbf16>
    %16 = vector.extract_strided_slice %15 {offsets = [0, 0, 0], sizes = [8, 8, 144], strides = [1, 1, 1]} : vector<8x12x144xbf16> to vector<8x8x144xbf16>
    %17 = vector.shape_cast %16 : vector<8x8x144xbf16> to vector<64x144xbf16>
    %c0_8 = arith.constant 0 : index
    %c0_9 = arith.constant 0 : index
    %c0_10 = arith.constant 0 : index
    %18 = vector.load %arg4[%c0_8, %c0_9, %c0_10] : memref<5x144x128xbf16, #tpu.memory_space<vmem>>, vector<1x144x128xbf16>
    %19 = vector.shape_cast %18 : vector<1x144x128xbf16> to vector<144x128xbf16>
    %cst_11 = arith.constant dense<0.000000e+00> : vector<64x128xf32>
    %20 = tpu.matmul %17, %19, %cst_11 {dimension_numbers = #tpu.dot_dimension_numbers<[1], [0], [0], [1], [0, 0, 1, 1], [], []>} : vector<64x144xbf16>, vector<144x128xbf16>, vector<64x128xf32> -> vector<64x128xf32>
    %21 = vector.extract_strided_slice %15 {offsets = [0, 1, 0], sizes = [8, 8, 144], strides = [1, 1, 1]} : vector<8x12x144xbf16> to vector<8x8x144xbf16>
    %22 = vector.shape_cast %21 : vector<8x8x144xbf16> to vector<64x144xbf16>
    %c1 = arith.constant 1 : index
    %c0_12 = arith.constant 0 : index
    %c0_13 = arith.constant 0 : index
    %23 = vector.load %arg4[%c1, %c0_12, %c0_13] : memref<5x144x128xbf16, #tpu.memory_space<vmem>>, vector<1x144x128xbf16>
    %24 = vector.shape_cast %23 : vector<1x144x128xbf16> to vector<144x128xbf16>
    %cst_14 = arith.constant dense<0.000000e+00> : vector<64x128xf32>
    %25 = tpu.matmul %22, %24, %cst_14 {dimension_numbers = #tpu.dot_dimension_numbers<[1], [0], [0], [1], [0, 0, 1, 1], [], []>} : vector<64x144xbf16>, vector<144x128xbf16>, vector<64x128xf32> -> vector<64x128xf32>
    %26 = arith.addf %20, %25 : vector<64x128xf32>
    %27 = vector.extract_strided_slice %15 {offsets = [0, 2, 0], sizes = [8, 8, 144], strides = [1, 1, 1]} : vector<8x12x144xbf16> to vector<8x8x144xbf16>
    %28 = vector.shape_cast %27 : vector<8x8x144xbf16> to vector<64x144xbf16>
    %c2 = arith.constant 2 : index
    %c0_15 = arith.constant 0 : index
    %c0_16 = arith.constant 0 : index
    %29 = vector.load %arg4[%c2, %c0_15, %c0_16] : memref<5x144x128xbf16, #tpu.memory_space<vmem>>, vector<1x144x128xbf16>
    %30 = vector.shape_cast %29 : vector<1x144x128xbf16> to vector<144x128xbf16>
    %cst_17 = arith.constant dense<0.000000e+00> : vector<64x128xf32>
    %31 = tpu.matmul %28, %30, %cst_17 {dimension_numbers = #tpu.dot_dimension_numbers<[1], [0], [0], [1], [0, 0, 1, 1], [], []>} : vector<64x144xbf16>, vector<144x128xbf16>, vector<64x128xf32> -> vector<64x128xf32>
    %32 = arith.addf %26, %31 : vector<64x128xf32>
    %33 = vector.extract_strided_slice %15 {offsets = [0, 3, 0], sizes = [8, 8, 144], strides = [1, 1, 1]} : vector<8x12x144xbf16> to vector<8x8x144xbf16>
    %34 = vector.shape_cast %33 : vector<8x8x144xbf16> to vector<64x144xbf16>
    %c3 = arith.constant 3 : index
    %c0_18 = arith.constant 0 : index
    %c0_19 = arith.constant 0 : index
    %35 = vector.load %arg4[%c3, %c0_18, %c0_19] : memref<5x144x128xbf16, #tpu.memory_space<vmem>>, vector<1x144x128xbf16>
    %36 = vector.shape_cast %35 : vector<1x144x128xbf16> to vector<144x128xbf16>
    %cst_20 = arith.constant dense<0.000000e+00> : vector<64x128xf32>
    %37 = tpu.matmul %34, %36, %cst_20 {dimension_numbers = #tpu.dot_dimension_numbers<[1], [0], [0], [1], [0, 0, 1, 1], [], []>} : vector<64x144xbf16>, vector<144x128xbf16>, vector<64x128xf32> -> vector<64x128xf32>
    %38 = arith.addf %32, %37 : vector<64x128xf32>
    %39 = vector.extract_strided_slice %15 {offsets = [0, 4, 0], sizes = [8, 8, 144], strides = [1, 1, 1]} : vector<8x12x144xbf16> to vector<8x8x144xbf16>
    %40 = vector.shape_cast %39 : vector<8x8x144xbf16> to vector<64x144xbf16>
    %c4 = arith.constant 4 : index
    %c0_21 = arith.constant 0 : index
    %c0_22 = arith.constant 0 : index
    %41 = vector.load %arg4[%c4, %c0_21, %c0_22] : memref<5x144x128xbf16, #tpu.memory_space<vmem>>, vector<1x144x128xbf16>
    %42 = vector.shape_cast %41 : vector<1x144x128xbf16> to vector<144x128xbf16>
    %cst_23 = arith.constant dense<0.000000e+00> : vector<64x128xf32>
    %43 = tpu.matmul %40, %42, %cst_23 {dimension_numbers = #tpu.dot_dimension_numbers<[1], [0], [0], [1], [0, 0, 1, 1], [], []>} : vector<64x144xbf16>, vector<144x128xbf16>, vector<64x128xf32> -> vector<64x128xf32>
    %44 = arith.addf %38, %43 : vector<64x128xf32>
    %c0_24 = arith.constant 0 : index
    %c0_25 = arith.constant 0 : index
    %45 = vector.load %arg5[%c0_24, %c0_25] : memref<1x128xf32, #tpu.memory_space<vmem>>, vector<1x128xf32>
    %46 = vector.broadcast %45 : vector<1x128xf32> to vector<64x128xf32>
    %47 = arith.addf %44, %46 : vector<64x128xf32>
    %cst_26 = arith.constant 0.000000e+00 : f32
    %48 = vector.broadcast %cst_26 : f32 to vector<64x128xf32>
    %49 = arith.maximumf %47, %48 : vector<64x128xf32>
    %50 = vector.shape_cast %49 : vector<64x128xf32> to vector<8x8x128xf32>
    %51 = arith.truncf %50 : vector<8x8x128xf32> to vector<8x8x128xbf16>
    %52 = vector.extract_strided_slice %51 {offsets = [0, 0, 0], sizes = [8, 1, 128], strides = [1, 1, 1]} : vector<8x8x128xbf16> to vector<8x1x128xbf16>
    %53 = vector.shape_cast %52 : vector<8x1x128xbf16> to vector<8x128xbf16>
    %c0_27 = arith.constant 0 : index
    %c0_28 = arith.constant 0 : index
    %c0_29 = arith.constant 0 : index
    %54 = vector.load %arg6[%c0_27, %c0_28, %c0_29] : memref<8x128x120xbf16, #tpu.memory_space<vmem>>, vector<1x128x120xbf16>
    %55 = vector.shape_cast %54 : vector<1x128x120xbf16> to vector<128x120xbf16>
    %cst_30 = arith.constant dense<0.000000e+00> : vector<8x120xf32>
    %56 = tpu.matmul %53, %55, %cst_30 {dimension_numbers = #tpu.dot_dimension_numbers<[1], [0], [0], [1], [0, 0, 1, 1], [], []>} : vector<8x128xbf16>, vector<128x120xbf16>, vector<8x120xf32> -> vector<8x120xf32>
    %57 = vector.extract_strided_slice %51 {offsets = [0, 1, 0], sizes = [8, 1, 128], strides = [1, 1, 1]} : vector<8x8x128xbf16> to vector<8x1x128xbf16>
    %58 = vector.shape_cast %57 : vector<8x1x128xbf16> to vector<8x128xbf16>
    %c1_31 = arith.constant 1 : index
    %c0_32 = arith.constant 0 : index
    %c0_33 = arith.constant 0 : index
    %59 = vector.load %arg6[%c1_31, %c0_32, %c0_33] : memref<8x128x120xbf16, #tpu.memory_space<vmem>>, vector<1x128x120xbf16>
    %60 = vector.shape_cast %59 : vector<1x128x120xbf16> to vector<128x120xbf16>
    %cst_34 = arith.constant dense<0.000000e+00> : vector<8x120xf32>
    %61 = tpu.matmul %58, %60, %cst_34 {dimension_numbers = #tpu.dot_dimension_numbers<[1], [0], [0], [1], [0, 0, 1, 1], [], []>} : vector<8x128xbf16>, vector<128x120xbf16>, vector<8x120xf32> -> vector<8x120xf32>
    %62 = arith.addf %56, %61 : vector<8x120xf32>
    %63 = vector.extract_strided_slice %51 {offsets = [0, 2, 0], sizes = [8, 1, 128], strides = [1, 1, 1]} : vector<8x8x128xbf16> to vector<8x1x128xbf16>
    %64 = vector.shape_cast %63 : vector<8x1x128xbf16> to vector<8x128xbf16>
    %c2_35 = arith.constant 2 : index
    %c0_36 = arith.constant 0 : index
    %c0_37 = arith.constant 0 : index
    %65 = vector.load %arg6[%c2_35, %c0_36, %c0_37] : memref<8x128x120xbf16, #tpu.memory_space<vmem>>, vector<1x128x120xbf16>
    %66 = vector.shape_cast %65 : vector<1x128x120xbf16> to vector<128x120xbf16>
    %cst_38 = arith.constant dense<0.000000e+00> : vector<8x120xf32>
    %67 = tpu.matmul %64, %66, %cst_38 {dimension_numbers = #tpu.dot_dimension_numbers<[1], [0], [0], [1], [0, 0, 1, 1], [], []>} : vector<8x128xbf16>, vector<128x120xbf16>, vector<8x120xf32> -> vector<8x120xf32>
    %68 = arith.addf %62, %67 : vector<8x120xf32>
    %69 = vector.extract_strided_slice %51 {offsets = [0, 3, 0], sizes = [8, 1, 128], strides = [1, 1, 1]} : vector<8x8x128xbf16> to vector<8x1x128xbf16>
    %70 = vector.shape_cast %69 : vector<8x1x128xbf16> to vector<8x128xbf16>
    %c3_39 = arith.constant 3 : index
    %c0_40 = arith.constant 0 : index
    %c0_41 = arith.constant 0 : index
    %71 = vector.load %arg6[%c3_39, %c0_40, %c0_41] : memref<8x128x120xbf16, #tpu.memory_space<vmem>>, vector<1x128x120xbf16>
    %72 = vector.shape_cast %71 : vector<1x128x120xbf16> to vector<128x120xbf16>
    %cst_42 = arith.constant dense<0.000000e+00> : vector<8x120xf32>
    %73 = tpu.matmul %70, %72, %cst_42 {dimension_numbers = #tpu.dot_dimension_numbers<[1], [0], [0], [1], [0, 0, 1, 1], [], []>} : vector<8x128xbf16>, vector<128x120xbf16>, vector<8x120xf32> -> vector<8x120xf32>
    %74 = arith.addf %68, %73 : vector<8x120xf32>
    %75 = vector.extract_strided_slice %51 {offsets = [0, 4, 0], sizes = [8, 1, 128], strides = [1, 1, 1]} : vector<8x8x128xbf16> to vector<8x1x128xbf16>
    %76 = vector.shape_cast %75 : vector<8x1x128xbf16> to vector<8x128xbf16>
    %c4_43 = arith.constant 4 : index
    %c0_44 = arith.constant 0 : index
    %c0_45 = arith.constant 0 : index
    %77 = vector.load %arg6[%c4_43, %c0_44, %c0_45] : memref<8x128x120xbf16, #tpu.memory_space<vmem>>, vector<1x128x120xbf16>
    %78 = vector.shape_cast %77 : vector<1x128x120xbf16> to vector<128x120xbf16>
    %cst_46 = arith.constant dense<0.000000e+00> : vector<8x120xf32>
    %79 = tpu.matmul %76, %78, %cst_46 {dimension_numbers = #tpu.dot_dimension_numbers<[1], [0], [0], [1], [0, 0, 1, 1], [], []>} : vector<8x128xbf16>, vector<128x120xbf16>, vector<8x120xf32> -> vector<8x120xf32>
    %80 = arith.addf %74, %79 : vector<8x120xf32>
    %81 = vector.extract_strided_slice %51 {offsets = [0, 5, 0], sizes = [8, 1, 128], strides = [1, 1, 1]} : vector<8x8x128xbf16> to vector<8x1x128xbf16>
    %82 = vector.shape_cast %81 : vector<8x1x128xbf16> to vector<8x128xbf16>
    %c5 = arith.constant 5 : index
    %c0_47 = arith.constant 0 : index
    %c0_48 = arith.constant 0 : index
    %83 = vector.load %arg6[%c5, %c0_47, %c0_48] : memref<8x128x120xbf16, #tpu.memory_space<vmem>>, vector<1x128x120xbf16>
    %84 = vector.shape_cast %83 : vector<1x128x120xbf16> to vector<128x120xbf16>
    %cst_49 = arith.constant dense<0.000000e+00> : vector<8x120xf32>
    %85 = tpu.matmul %82, %84, %cst_49 {dimension_numbers = #tpu.dot_dimension_numbers<[1], [0], [0], [1], [0, 0, 1, 1], [], []>} : vector<8x128xbf16>, vector<128x120xbf16>, vector<8x120xf32> -> vector<8x120xf32>
    %86 = arith.addf %80, %85 : vector<8x120xf32>
    %87 = vector.extract_strided_slice %51 {offsets = [0, 6, 0], sizes = [8, 1, 128], strides = [1, 1, 1]} : vector<8x8x128xbf16> to vector<8x1x128xbf16>
    %88 = vector.shape_cast %87 : vector<8x1x128xbf16> to vector<8x128xbf16>
    %c6 = arith.constant 6 : index
    %c0_50 = arith.constant 0 : index
    %c0_51 = arith.constant 0 : index
    %89 = vector.load %arg6[%c6, %c0_50, %c0_51] : memref<8x128x120xbf16, #tpu.memory_space<vmem>>, vector<1x128x120xbf16>
    %90 = vector.shape_cast %89 : vector<1x128x120xbf16> to vector<128x120xbf16>
    %cst_52 = arith.constant dense<0.000000e+00> : vector<8x120xf32>
    %91 = tpu.matmul %88, %90, %cst_52 {dimension_numbers = #tpu.dot_dimension_numbers<[1], [0], [0], [1], [0, 0, 1, 1], [], []>} : vector<8x128xbf16>, vector<128x120xbf16>, vector<8x120xf32> -> vector<8x120xf32>
    %92 = arith.addf %86, %91 : vector<8x120xf32>
    %93 = vector.extract_strided_slice %51 {offsets = [0, 7, 0], sizes = [8, 1, 128], strides = [1, 1, 1]} : vector<8x8x128xbf16> to vector<8x1x128xbf16>
    %94 = vector.shape_cast %93 : vector<8x1x128xbf16> to vector<8x128xbf16>
    %c7 = arith.constant 7 : index
    %c0_53 = arith.constant 0 : index
    %c0_54 = arith.constant 0 : index
    %95 = vector.load %arg6[%c7, %c0_53, %c0_54] : memref<8x128x120xbf16, #tpu.memory_space<vmem>>, vector<1x128x120xbf16>
    %96 = vector.shape_cast %95 : vector<1x128x120xbf16> to vector<128x120xbf16>
    %cst_55 = arith.constant dense<0.000000e+00> : vector<8x120xf32>
    %97 = tpu.matmul %94, %96, %cst_55 {dimension_numbers = #tpu.dot_dimension_numbers<[1], [0], [0], [1], [0, 0, 1, 1], [], []>} : vector<8x128xbf16>, vector<128x120xbf16>, vector<8x120xf32> -> vector<8x120xf32>
    %98 = arith.addf %92, %97 : vector<8x120xf32>
    %c0_56 = arith.constant 0 : index
    %c0_57 = arith.constant 0 : index
    %99 = vector.load %arg7[%c0_56, %c0_57] : memref<1x120xf32, #tpu.memory_space<vmem>>, vector<1x120xf32>
    %100 = vector.broadcast %99 : vector<1x120xf32> to vector<8x120xf32>
    %101 = arith.addf %98, %100 : vector<8x120xf32>
    %cst_58 = arith.constant 0.000000e+00 : f32
    %102 = vector.broadcast %cst_58 : f32 to vector<8x120xf32>
    %103 = arith.maximumf %101, %102 : vector<8x120xf32>
    %104 = arith.truncf %103 : vector<8x120xf32> to vector<8x120xbf16>
    %c0_59 = arith.constant 0 : index
    %c0_60 = arith.constant 0 : index
    %105 = vector.load %arg8[%c0_59, %c0_60] : memref<120x84xbf16, #tpu.memory_space<vmem>>, vector<120x84xbf16>
    %cst_61 = arith.constant dense<0.000000e+00> : vector<8x84xf32>
    %106 = tpu.matmul %104, %105, %cst_61 {dimension_numbers = #tpu.dot_dimension_numbers<[1], [0], [0], [1], [0, 0, 1, 1], [], []>} : vector<8x120xbf16>, vector<120x84xbf16>, vector<8x84xf32> -> vector<8x84xf32>
    %c0_62 = arith.constant 0 : index
    %c0_63 = arith.constant 0 : index
    %107 = vector.load %arg9[%c0_62, %c0_63] : memref<1x84xf32, #tpu.memory_space<vmem>>, vector<1x84xf32>
    %108 = vector.broadcast %107 : vector<1x84xf32> to vector<8x84xf32>
    %109 = arith.addf %106, %108 : vector<8x84xf32>
    %cst_64 = arith.constant 0.000000e+00 : f32
    %110 = vector.broadcast %cst_64 : f32 to vector<8x84xf32>
    %111 = arith.maximumf %109, %110 : vector<8x84xf32>
    %112 = arith.truncf %111 : vector<8x84xf32> to vector<8x84xbf16>
    %c0_65 = arith.constant 0 : index
    %c0_66 = arith.constant 0 : index
    %113 = vector.load %arg10[%c0_65, %c0_66] : memref<84x128xbf16, #tpu.memory_space<vmem>>, vector<84x128xbf16>
    %cst_67 = arith.constant dense<0.000000e+00> : vector<8x128xf32>
    %114 = tpu.matmul %112, %113, %cst_67 {dimension_numbers = #tpu.dot_dimension_numbers<[1], [0], [0], [1], [0, 0, 1, 1], [], []>} : vector<8x84xbf16>, vector<84x128xbf16>, vector<8x128xf32> -> vector<8x128xf32>
    %c0_68 = arith.constant 0 : index
    %c0_69 = arith.constant 0 : index
    %115 = vector.load %arg11[%c0_68, %c0_69] : memref<1x128xf32, #tpu.memory_space<vmem>>, vector<1x128xf32>
    %116 = vector.broadcast %115 : vector<1x128xf32> to vector<8x128xf32>
    %117 = arith.addf %114, %116 : vector<8x128xf32>
    %c0_70 = arith.constant 0 : index
    %c0_71 = arith.constant 0 : index
    %118 = vector.load %arg12[%c0_70, %c0_71] : memref<8x128xf32, #tpu.memory_space<vmem>>, vector<8x128xf32>
    tpu.vector_store %arg12[%c0_70, %c0_71], %117 {strides = array<i32>} : memref<8x128xf32, #tpu.memory_space<vmem>>, vector<8x128xf32>,
    return
  }
  func.func @transform_0(%arg0: i32) -> (i32, i32, i32) {
    %c0_i32 = arith.constant 0 : i32
    %c0_i32_0 = arith.constant 0 : i32
    %c0_i32_1 = arith.constant 0 : i32
    return %arg0, %c0_i32, %c0_i32_0 : i32, i32, i32
  }
  func.func @transform_1(%arg0: i32) -> (i32, i32) {
    %c0_i32 = arith.constant 0 : i32
    %c0_i32_0 = arith.constant 0 : i32
    %c0_i32_1 = arith.constant 0 : i32
    return %c0_i32, %c0_i32_0 : i32, i32
  }
  func.func @transform_2(%arg0: i32) -> (i32, i32) {
    %c0_i32 = arith.constant 0 : i32
    %c0_i32_0 = arith.constant 0 : i32
    %c0_i32_1 = arith.constant 0 : i32
    return %c0_i32, %c0_i32_0 : i32, i32
  }
  func.func @transform_3(%arg0: i32) -> (i32, i32, i32) {
    %c0_i32 = arith.constant 0 : i32
    %c0_i32_0 = arith.constant 0 : i32
    %c0_i32_1 = arith.constant 0 : i32
    %c0_i32_2 = arith.constant 0 : i32
    return %c0_i32, %c0_i32_0, %c0_i32_1 : i32, i32, i32
  }
  func.func @transform_4(%arg0: i32) -> (i32, i32) {
    %c0_i32 = arith.constant 0 : i32
    %c0_i32_0 = arith.constant 0 : i32
    %c0_i32_1 = arith.constant 0 : i32
    return %c0_i32, %c0_i32_0 : i32, i32
  }
  func.func @transform_5(%arg0: i32) -> (i32, i32, i32) {
    %c0_i32 = arith.constant 0 : i32
    %c0_i32_0 = arith.constant 0 : i32
    %c0_i32_1 = arith.constant 0 : i32
    %c0_i32_2 = arith.constant 0 : i32
    return %c0_i32, %c0_i32_0, %c0_i32_1 : i32, i32, i32
  }
  func.func @transform_6(%arg0: i32) -> (i32, i32) {
    %c0_i32 = arith.constant 0 : i32
    %c0_i32_0 = arith.constant 0 : i32
    %c0_i32_1 = arith.constant 0 : i32
    return %c0_i32, %c0_i32_0 : i32, i32
  }
  func.func @transform_7(%arg0: i32) -> (i32, i32) {
    %c0_i32 = arith.constant 0 : i32
    %c0_i32_0 = arith.constant 0 : i32
    %c0_i32_1 = arith.constant 0 : i32
    return %c0_i32, %c0_i32_0 : i32, i32
  }
  func.func @transform_8(%arg0: i32) -> (i32, i32) {
    %c0_i32 = arith.constant 0 : i32
    %c0_i32_0 = arith.constant 0 : i32
    %c0_i32_1 = arith.constant 0 : i32
    return %c0_i32, %c0_i32_0 : i32, i32
  }
  func.func @transform_9(%arg0: i32) -> (i32, i32) {
    %c0_i32 = arith.constant 0 : i32
    %c0_i32_0 = arith.constant 0 : i32
    %c0_i32_1 = arith.constant 0 : i32
    return %c0_i32, %c0_i32_0 : i32, i32
  }
  func.func @transform_10(%arg0: i32) -> (i32, i32) {
    %c0_i32 = arith.constant 0 : i32
    %c0_i32_0 = arith.constant 0 : i32
    %c0_i32_1 = arith.constant 0 : i32
    return %c0_i32, %c0_i32_0 : i32, i32
  }
  func.func @transform_11(%arg0: i32) -> (i32, i32) {
    %c0_i32 = arith.constant 0 : i32
    %c0_i32_0 = arith.constant 0 : i32
    return %arg0, %c0_i32 : i32, i32
  }
}

</mosaic_0001>

<bundles_post_ra>
// kernel: lenet5_forward.1
= control target key start
LH: loop header
LB: loop body
LE: loop exit
PB: predicated region body
PF: predicated region fallthrough
CT: control target
= control target key end

     0   :  { %vm289_vm0 = vcmask 97280   ;;  %vm326_vm1 = vcmask 1045504   ;;  %v5631_v44 = vmov 0   ;;  %v83_v62 = vlaneseq  ;;  %s5619_s1 = inlined_call_operand.vmem [shape: bf16[140,144], index: 1, kind: input, shape index: {}]   ;;  %s5620_s0 = inlined_call_operand.vmem [shape: bf16[8,24,140], index: 0, kind: input, shape index: {}]   ;;  %s5621_s3 = inlined_call_operand.vmem [shape: bf16[5,144,128], index: 3, kind: input, shape index: {}]   ;;  %s5622_s2 = inlined_call_operand.vmem [shape: f32[1,144], index: 2, kind: input, shape index: {}]   ;;  %s5623_s5 = inlined_call_operand.vmem [shape: bf16[8,128,120], index: 5, kind: input, shape index: {}]   ;;  %s5624_s4 = inlined_call_operand.vmem [shape: f32[1,128], index: 4, kind: input, shape index: {}]   ;;  %s5625_s7 = inlined_call_operand.vmem [shape: bf16[120,84], index: 7, kind: input, shape index: {}]   ;;  %s5626_s9 = inlined_call_operand.vmem [shape: bf16[84,128], index: 9, kind: input, shape index: {}]   ;;  %s5627_s6 = inlined_call_operand.vmem [shape: f32[1,120], index: 6, kind: input, shape index: {}]   ;;  %s5628_s8 = inlined_call_operand.vmem [shape: f32[1,84], index: 8, kind: input, shape index: {}]   ;;  %s5629_s10 = inlined_call_operand.vmem [shape: f32[1,128], index: 10, kind: input, shape index: {}]   ;;  %s5630_s11 = inlined_call_operand.vmem [shape: f32[8,128], index: 11, kind: output, shape index: {}]  }
   0x1   :  { %v3985_v0 = vld [vmem:[%s5619_s1 + $0x4] ss:$8 sps:$4 sm:$0xff]   ;;  %v3987_v1 = vld [vmem:[%s5619_s1] ss:$8 sps:$4 sm:$0xff]   ;;  %v3988_v2 = vld [vmem:[%s5619_s1 + $0x14] ss:$8 sps:$4 sm:$0xff]   ;;  %1038 = vmatprep.subr.bf16.mxu1 %v5631_v44 }
   0x2   :  { %333 = vmatprep.subr.bf16.mxu0 %v3985_v0  ;;  %v3990_v3 = vld [vmem:[%s5619_s1 + $0x10] ss:$8 sps:$4 sm:$0xff]   ;;  %v3991_v4 = vld [vmem:[%s5619_s1 + $0x24] ss:$8 sps:$4 sm:$0xff]   ;;  %v3993_v5 = vld [vmem:[%s5619_s1 + $0x20] ss:$8 sps:$4 sm:$0xff]  }
   0x3   :  { %334 = vmatpush1.bf16.msra.mxu0 %v3987_v1  ;;  %v3994_v6 = vld [vmem:[%s5619_s1 + $0x34] ss:$8 sps:$4 sm:$0xff]   ;;  %v3996_v7 = vld [vmem:[%s5619_s1 + $0x30] ss:$8 sps:$4 sm:$0xff]   ;;  %v3997_v8 = vld [vmem:[%s5619_s1 + $0x44] ss:$8 sps:$4 sm:$0xff]  }
   0x4   :  { %335 = vmatprep.subr.bf16.mxu0 %v3988_v2  ;;  %v4014_v9 = vld [vmem:[%s5620_s0 + $0x4] ss:$8 sps:$4 sm:$0xff]   ;;  %v3999_v10 = vld [vmem:[%s5619_s1 + $0x40] ss:$8 sps:$4 sm:$0xff]   ;;  %v4000_v11 = vld [vmem:[%s5619_s1 + $0x54] ss:$8 sps:$4 sm:$0xff]  }
   0x5   :  { %3257 = vmatprep.mubr.msk.bf16.mxu0 %vm289_vm0, %v4014_v9  ;;  %v4002_v12 = vld [vmem:[%s5619_s1 + $0x50] ss:$8 sps:$4 sm:$0xff]   ;;  %v4003_v13 = vld [vmem:[%s5619_s1 + $0x64] ss:$8 sps:$4 sm:$0xff]   ;;  %v4005_v14 = vld [vmem:[%s5619_s1 + $0x60] ss:$8 sps:$4 sm:$0xff]  }
   0x6   :  { %v4006_v15 = vld [vmem:[%s5619_s1 + $0x74] ss:$8 sps:$4 sm:$0xff]   ;;  %v4008_v16 = vld [vmem:[%s5619_s1 + $0x70] ss:$8 sps:$4 sm:$0xff]   ;;  %v4012_v20 = vld [vmem:[%s5620_s0] ss:$8 sps:$4 sm:$0xff]  }
   0x7   :  { %336 = vmatpush1.bf16.msra.mxu0 %v3990_v3  ;;  %v4009_v17 = vld [vmem:[%s5619_s1 + $0x84] ss:$8 sps:$4 sm:$0x3f]   ;;  %v4011_v18 = vld [vmem:[%s5619_s1 + $0x80] ss:$8 sps:$4 sm:$0x3f]  }
   0x8   :  { %337 = vmatprep.subr.bf16.mxu0 %v3991_v4  ;;  %v328_v19 = vsel %vm326_vm1, %v4011_v18, 0  ;;  %v4015_v21 = vld [vmem:[%s5620_s0 + $0x14] ss:$8 sps:$4 sm:$0xff]   ;;  %v4017_v22 = vld [vmem:[%s5620_s0 + $0x10] ss:$8 sps:$4 sm:$0xff]   ;;  %v4048_v43 = vld [vmem:[%s5621_s3 + $0x48] sm:$0xff]  }
   0x9   :  { %v4018_v23 = vld [vmem:[%s5620_s0 + $0x24] ss:$8 sps:$4 sm:$0xff]   ;;  %v4020_v24 = vld [vmem:[%s5620_s0 + $0x20] ss:$8 sps:$4 sm:$0xff]   ;;  %v4021_v25 = vld [vmem:[%s5620_s0 + $0x34] ss:$8 sps:$4 sm:$0xff]   ;;  %1039 = vmatpush1.bf16.msra.mxu1 %v4048_v43 }
   0xa   :  { %v4023_v26 = vld [vmem:[%s5620_s0 + $0x30] ss:$8 sps:$4 sm:$0xff]   ;;  %v4024_v27 = vld [vmem:[%s5620_s0 + $0x44] ss:$8 sps:$4 sm:$0xff]   ;;  %v4026_v28 = vld [vmem:[%s5620_s0 + $0x40] ss:$8 sps:$4 sm:$0xff]   ;;  %1040 = vmatprep.subr.bf16.mxu1 %v5631_v44 }
   0xb   :  { %338 = vmatpush1.bf16.msra.mxu0 %v3993_v5  ;;  %v4027_v29 = vld [vmem:[%s5620_s0 + $0x54] ss:$8 sps:$4 sm:$0xff]   ;;  %v4029_v30 = vld [vmem:[%s5620_s0 + $0x50] ss:$8 sps:$4 sm:$0xff]   ;;  %v4030_v31 = vld [vmem:[%s5620_s0 + $0x64] ss:$8 sps:$4 sm:$0xff]  }
   0xc   :  { %339 = vmatprep.subr.bf16.mxu0 %v3994_v6  ;;  %v4032_v32 = vld [vmem:[%s5620_s0 + $0x60] ss:$8 sps:$4 sm:$0xff]   ;;  %v4033_v33 = vld [vmem:[%s5620_s0 + $0x74] ss:$8 sps:$4 sm:$0xff]   ;;  %v4035_v34 = vld [vmem:[%s5620_s0 + $0x70] ss:$8 sps:$4 sm:$0xff]  }
   0xd   :  { %v4036_v35 = vld [vmem:[%s5620_s0 + $0x84] ss:$8 sps:$4 sm:$0xff]   ;;  %v4038_v36 = vld [vmem:[%s5620_s0 + $0x80] ss:$8 sps:$4 sm:$0xff]   ;;  %v4039_v37 = vld [vmem:[%s5620_s0 + $0x94] ss:$8 sps:$4 sm:$0xff]  }
   0xe   :  { %v4041_v38 = vld [vmem:[%s5620_s0 + $0x90] ss:$8 sps:$4 sm:$0xff]   ;;  %v4042_v39 = vld [vmem:[%s5620_s0 + $0xa4] ss:$8 sps:$4 sm:$0xff]   ;;  %v4044_v40 = vld [vmem:[%s5620_s0 + $0xa0] ss:$8 sps:$4 sm:$0xff]  }
   0xf   :  { %340 = vmatpush1.bf16.msra.mxu0 %v3996_v7  ;;  %v4045_v41 = vld [vmem:[%s5620_s0 + $0xb4] ss:$8 sps:$4 sm:$0xff]   ;;  %v4047_v42 = vld [vmem:[%s5620_s0 + $0xb0] ss:$8 sps:$4 sm:$0xff]   ;;  %v4051_v47 = vld [vmem:[%s5621_s3 + $0xe0] sm:$0xff]   ;;  %v84_v63 = vshrl.u32 %v83_v62, 7 }
  0x10   :  { %341 = vmatprep.subr.bf16.mxu0 %v3997_v8  ;;  %v4049_v45 = vld [vmem:[%s5621_s3 + $0xd8] sm:$0xff]   ;;  %v4050_v46 = vld [vmem:[%s5621_s3 + $0x50] sm:$0xff]   ;;  %v4053_v49 = vld [vmem:[%s5621_s3 + $0xe8] sm:$0xff]   ;;  %vm566_vm2 = vcmask 1043456   ;;  %vm809_vm3 = vsmask.f32 3328 }
  0x11   :  { %1041 = vmatpush1.bf16.msra.mxu1 %v4050_v46  ;;  %v4052_v48 = vld [vmem:[%s5621_s3 + $0x58] sm:$0xff]   ;;  %v4054_v50 = vld [vmem:[%s5621_s3 + $0x60] sm:$0xff]   ;;  %v4055_v51 = vld [vmem:[%s5621_s3 + $0xf0] sm:$0xff]   ;;  %v85_v0 = vsub.s32 0, %v84_v63  ;;  %v89_v3 = vsub.s32 1, %v84_v63  ;;  %vm1025_vm8 = vcmask 130048  }
  0x12   :  { %1042 = vmatprep.subr.bf16.mxu1 %v5631_v44  ;;  %v4056_v52 = vld [vmem:[%s5621_s3 + $0x68] sm:$0xff]   ;;  %v4057_v53 = vld [vmem:[%s5621_s3 + $0xf8] sm:$0xff]   ;;  %v4058_v54 = vld [vmem:[%s5621_s3 + $0x70] sm:$0xff]   ;;  %vm810_vm4 = vsmask.f32 7440  ;;  %vm1246_vm10 = vcmask 1042432  }
  0x13   :  { %342 = vmatpush1.bf16.msra.mxu0 %v3999_v10  ;;  %v4059_v55 = vld [vmem:[%s5621_s3 + $0x100] sm:$0xff]   ;;  %v4060_v56 = vld [vmem:[%s5621_s3 + $0x78] sm:$0xff]   ;;  %v4061_v57 = vld [vmem:[%s5621_s3 + $0x108] sm:$0xff]   ;;  %vm1467_vm5 = vsmask.f32 2304  ;;  %vm1247_vm11 = vcmask 1046532  }
  0x14   :  { %343 = vmatprep.subr.bf16.mxu0 %v4000_v11  ;;  %v4062_v58 = vld [vmem:[%s5621_s3 + $0x80] sm:$0xff]   ;;  %v4063_v59 = vld [vmem:[%s5621_s3 + $0x110] sm:$0xff]   ;;  %v4064_v60 = vld [vmem:[%s5621_s3 + $0x88] sm:$0xff]   ;;  %vm1468_vm6 = vsmask.f32 6416  ;;  %vm1736_vm13 = vcmask 1041408  }
  0x15   :  { %1043 = vmatpush1.bf16.msra.mxu1 %v4052_v48  ;;  %v4065_v61 = vld [vmem:[%s5621_s3 + $0x118] sm:$0xff]   ;;  %v81_v1 = vld [vmem:[%s5622_s2] sm:$0x3]  ;;  %vm4513_vm7 = vmor %vm809_vm3, %vm810_vm4  ;;  %vm1737_vm14 = vcmask 1045508   ;;  %vm2041_vm3 = vcmask 1042434   ;;  %vm2044_vm4 = vcmask 1043459  }
  0x16   :  { %1044 = vmatprep.subr.bf16.mxu1 %v5631_v44  ;;  %v4448_v6 = vrot.slane %v81_v1, %v85_v0  ;;  %v4450_v8 = vrot.slane %v81_v1, %v89_v3  ;;  %vm4532_vm9 = vmor %vm1467_vm5, %vm1468_vm6  ;;  %vm2047_vm5 = vcmask 1044484   ;;  %vm2050_vm6 = vcmask 1045509  }
  0x17   :  { %344 = vmatpush1.bf16.msra.mxu0 %v4002_v12  ;;  %vm4801_vm12 = vmor %vm1246_vm10, %vm1247_vm11 }
  0x18   :  { %345 = vmatprep.subr.bf16.mxu0 %v4003_v13  ;;  %vm4852_vm15 = vmor %vm1736_vm13, %vm1737_vm14 }
  0x19   :  { %1045 = vmatpush1.bf16.msra.mxu1 %v4054_v50 }
  0x1a   :  { %1046 = vmatprep.subr.bf16.mxu1 %v5631_v44 }
  0x1b   :  { %346 = vmatpush1.bf16.msra.mxu0 %v4005_v14 }
  0x1c   :  { %347 = vmatprep.subr.bf16.mxu0 %v4006_v15 }
  0x1d   :  { %1047 = vmatpush1.bf16.msra.mxu1 %v4056_v52 }
  0x1e   :  { %1048 = vmatprep.subr.bf16.mxu1 %v5631_v44 }
  0x1f   :  { %348 = vmatpush1.bf16.msra.mxu0 %v4008_v16 }
  0x20   :  { %3256 = vmatprep.subr.msk.bf16.mxu0 %vm326_vm1, %v4009_v17  ;;  %vm2038_vm1 = vcmask 1041409  }
  0x21   :  { %1049 = vmatpush1.bf16.msra.mxu1 %v4058_v54 }
  0x22   :  { %1050 = vmatprep.subr.bf16.mxu1 %v5631_v44 }
  0x23   :  { %350 = vmatpush1.bf16.msra.mxu0 %v328_v19 }
  0x24   :  { %1663 = vmatprep.subr.bf16.mxu0 %v5631_v44 }
  0x25   :  { %1051 = vmatpush1.bf16.msra.mxu1 %v4060_v56 }
  0x26   :  { %366 = vmatmul.mubr.bf16.vlgmr.msra.gmra.mrb[0].mxu0 %v4012_v20  ;;  %1052 = vmatprep.subr.bf16.mxu1 %v5631_v44 }
  0x27   :  { %3258 = vmatprep.mubr.msk.bf16.mxu0 %vm289_vm0, %v4015_v21  ;;  %1664 = vmatpush1.bf16.msra.mxu0 %v4049_v45 }
  0x28   :  { %1665 = vmatprep.subr.bf16.mxu0 %v5631_v44 }
  0x29   :  { %1053 = vmatpush1.bf16.msra.mxu1 %v4062_v58 }
  0x2a   :  { %1054 = vmatprep.subr.bf16.mxu1 %v5631_v44 }
  0x2b   :  { %1666 = vmatpush1.bf16.msra.mxu0 %v4051_v47 }
  0x2c   :  { %1667 = vmatprep.subr.bf16.mxu0 %v5631_v44 }
  0x2d   :  { %1055 = vmatpush1.bf16.msra.mxu1 %v4064_v60 }
  0x2e   :  { %376 = vmatmul.mubr.bf16.gmra.mrb[4].mxu0 %v4017_v22  ;;  %1181 = vmatprep.subr.bf16.mxu1 %v5631_v44 }
  0x2f   :  { %3259 = vmatprep.mubr.msk.bf16.mxu0 %vm289_vm0, %v4018_v23  ;;  %1668 = vmatpush1.bf16.msra.mxu0 %v4053_v49 }
  0x30   :  { %1669 = vmatprep.subr.bf16.mxu0 %v5631_v44 }
  0x33   :  { %1670 = vmatpush1.bf16.msra.mxu0 %v4055_v51 }
  0x34   :  { %1671 = vmatprep.subr.bf16.mxu0 %v5631_v44 }
  0x36   :  { %386 = vmatmul.mubr.bf16.gmra.mrb[8].mxu0 %v4020_v24 }
  0x37   :  { %3260 = vmatprep.mubr.msk.bf16.mxu0 %vm289_vm0, %v4021_v25  ;;  %1672 = vmatpush1.bf16.msra.mxu0 %v4057_v53 }
  0x38   :  { %1673 = vmatprep.subr.bf16.mxu0 %v5631_v44 }
  0x3b   :  { %1674 = vmatpush1.bf16.msra.mxu0 %v4059_v55 }
  0x3c   :  { %1675 = vmatprep.subr.bf16.mxu0 %v5631_v44 }
  0x3e   :  { %396 = vmatmul.mubr.bf16.gmra.mrb[12].mxu0 %v4023_v26 }
  0x3f   :  { %3261 = vmatprep.mubr.msk.bf16.mxu0 %vm289_vm0, %v4024_v27  ;;  %1676 = vmatpush1.bf16.msra.mxu0 %v4061_v57 }
  0x40   :  { %1677 = vmatprep.subr.bf16.mxu0 %v5631_v44 }
  0x43   :  { %1678 = vmatpush1.bf16.msra.mxu0 %v4063_v59 }
  0x44   :  { %1679 = vmatprep.subr.bf16.mxu0 %v5631_v44 }
  0x46   :  { %406 = vmatmul.mubr.bf16.gmra.mrb[16].mxu0 %v4026_v28 }
  0x47   :  { %3262 = vmatprep.mubr.msk.bf16.mxu0 %vm289_vm0, %v4027_v29  ;;  %1680 = vmatpush1.bf16.msra.mxu0 %v4065_v61 }
  0x4e   :  { %416 = vmatmul.mubr.bf16.gmra.mrb[20].mxu0 %v4029_v30 }
  0x4f   :  { %3263 = vmatprep.mubr.msk.bf16.mxu0 %vm289_vm0, %v4030_v31 }
  0x56   :  { %426 = vmatmul.mubr.bf16.gmra.mrb[24].mxu0 %v4032_v32 }
  0x57   :  { %3264 = vmatprep.mubr.msk.bf16.mxu0 %vm289_vm0, %v4033_v33 }
  0x5e   :  { %436 = vmatmul.mubr.bf16.gmra.mrb[28].mxu0 %v4035_v34 }
  0x5f   :  { %3265 = vmatprep.mubr.msk.bf16.mxu0 %vm289_vm0, %v4036_v35 }
  0x66   :  { %446 = vmatmul.mubr.bf16.gmra.mrb[32].mxu0 %v4038_v36 }
  0x67   :  { %3266 = vmatprep.mubr.msk.bf16.mxu0 %vm289_vm0, %v4039_v37 }
  0x6e   :  { %456 = vmatmul.mubr.bf16.gmra.mrb[36].mxu0 %v4041_v38 }
  0x6f   :  { %3267 = vmatprep.mubr.msk.bf16.mxu0 %vm289_vm0, %v4042_v39 }
  0x76   :  { %466 = vmatmul.mubr.bf16.gmra.mrb[40].mxu0 %v4044_v40 }
  0x77   :  { %3268 = vmatprep.mubr.msk.bf16.mxu0 %vm289_vm0, %v4045_v41  ;;  %vm4173_vm0 = vmmov 0  }
  0x7e   :  { %476 = vmatmul.mubr.bf16.gmra.mrb[44].mxu0 %v4047_v42 }
  0xf9   :  { %v367_v2 = vpop.f32.mrb[0].mxu0 }
  0xfa   :  { %v369_v4 = vpop.f32.mrb[1].mxu0  ;;  %v368_v15 = vadd.f32 %v367_v2, %v4448_v6 }
  0xfb   :  { %v371_v5 = vpop.f32.mrb[2].mxu0  ;;  %v370_v19 = vadd.f32 %v369_v4, %v4450_v8 }
  0xfc   :  { %v373_v7 = vpop.f32.mrb[3].mxu0  ;;  %v372_v9 = vadd.f32 %v371_v5, %v4448_v6  ;;  %v486_v25 = vmax.f32 %v368_v15, 0.0 }
  0xfd   :  { %v374_v10 = vadd.f32 %v373_v7, %v4450_v8  ;;  %v487_v28 = vmax.f32 %v370_v19, 0.0 }
  0xfe   :  { %v488_v12 = vmax.f32 %v372_v9, 0.0 }
  0xff   :  { %v489_v16 = vmax.f32 %v374_v10, 0.0 }
 0x100   :  { %v567_v23 = vrot.slane %v488_v12, 4 }
 0x101   :  { %v377_v11 = vpop.f32.mrb[4].mxu0  ;;  %v570_v26 = vrot.slane %v489_v16, 4 }
 0x102   :  { %v378_v13 = vadd.f32 %v377_v11, %v4448_v6  ;;  %v379_v14 = vpop.f32.mrb[5].mxu0 }
 0x103   :  { %v380_v17 = vadd.f32 %v379_v14, %v4450_v8  ;;  %v381_v18 = vpop.f32.mrb[6].mxu0 }
 0x104   :  { %v490_v20 = vmax.f32 %v378_v13, 0.0  ;;  %v383_v21 = vpop.f32.mrb[7].mxu0  ;;  %v382_v34 = vadd.f32 %v381_v18, %v4448_v6 }
 0x105   :  { %v491_v22 = vmax.f32 %v380_v17, 0.0  ;;  %v384_v38 = vadd.f32 %v383_v21, %v4450_v8 }
 0x106   :  { %v568_v24 = vrot.slane %v490_v20, 4  ;;  %v492_v54 = vmax.f32 %v382_v34, 0.0 }
 0x107   :  { %v571_v27 = vrot.slane %v491_v22, 4  ;;  %v493_v55 = vmax.f32 %v384_v38, 0.0 }
 0x108   :  { %v569_v29 = vsel %vm566_vm2, %v567_v23, %v568_v24  ;;  %v649_v30 = vadd.f32 %v568_v24, %v488_v12 }
 0x109   :  { %v647_v31 = vadd.f32 %v569_v29, %v486_v25  ;;  %v572_v32 = vsel %vm566_vm2, %v570_v26, %v571_v27  ;;  %v650_v33 = vadd.f32 %v571_v27, %v489_v16  ;;  %v387_v35 = vpop.f32.mrb[8].mxu0 }
 0x10a   :  { %v681_v36 = vmul.f32 0.5, %v649_v30  ;;  %v648_v37 = vadd.f32 %v572_v32, %v487_v28  ;;  %v388_v39 = vadd.f32 %v387_v35, %v4448_v6  ;;  %v389_v40 = vpop.f32.mrb[9].mxu0 }
 0x10b   :  { %v4463_v41 = vmul.f32 0.5, %v647_v31  ;;  %v682_v42 = vmul.f32 0.5, %v650_v33  ;;  %v390_v43 = vadd.f32 %v389_v40, %v4450_v8  ;;  %v391_v45 = vpop.f32.mrb[10].mxu0 }
 0x10c   :  { %v4466_v46 = vmul.f32 0.5, %v648_v37  ;;  %v494_v47 = vmax.f32 %v388_v39, 0.0  ;;  %v392_v48 = vadd.f32 %v391_v45, %v4448_v6  ;;  %v393_v49 = vpop.f32.mrb[11].mxu0 }
 0x10d   :  { %v4469_v50 = vpack.c.bf16 %v682_v42, %v681_v36  ;;  %v495_v51 = vmax.f32 %v390_v43, 0.0  ;;  %v394_v52 = vadd.f32 %v393_v49, %v4450_v8 }
 0x10e   :  { %v4474_v53 = vpack.c.bf16 %v4466_v46, %v4463_v41  ;;  %v496_v56 = vmax.f32 %v392_v48, 0.0  ;;  %v573_v58 = vrot.slane %v494_v47, 4 }
 0x10f   :  { %v1474_v57 = vshrl.u32 %v4469_v50, 16  ;;  %v497_v59 = vmax.f32 %v394_v52, 0.0  ;;  %v822_v60 = vshll.u32 %v4469_v50, 16  ;;  %v576_v61 = vrot.slane %v495_v51, 4 }
 0x110   :  { %v574_v62 = vrot.slane %v496_v56, 4  ;;  %v813_v63 = vshrl.u32 %v4474_v53, 16  ;;  %v816_v0 = vshll.u32 %v4474_v53, 16 }
 0x111   :  { %v4480_v1 = vrot.slane %v1474_v57, 5  ;;  %v577_v2 = vrot.slane %v497_v59, 4  ;;  %v397_v3 = vpop.f32.mrb[12].mxu0  ;;  %v824_v4 = vrot.slane %v822_v60, 5  ;;  %v4482_v5 = vrot.slane %v822_v60, 6 }
 0x112   :  { %v575_v7 = vsel %vm566_vm2, %v573_v58, %v574_v62  ;;  %v653_v9 = vadd.f32 %v574_v62, %v494_v47  ;;  %v4486_v10 = vadd.f32 %v397_v3, %v4448_v6  ;;  %v399_v11 = vpop.f32.mrb[13].mxu0  ;;  %v815_v12 = vrot.slane %v813_v63, 4 }
 0x113   :  { %v651_v13 = vadd.f32 %v575_v7, %v492_v54  ;;  %v578_v14 = vsel %vm566_vm2, %v576_v61, %v577_v2  ;;  %v654_v15 = vadd.f32 %v577_v2, %v495_v51  ;;  %v4490_v16 = vadd.f32 %v399_v11, %v4450_v8  ;;  %v401_v17 = vpop.f32.mrb[14].mxu0 }
 0x114   :  { %v685_v18 = vmul.f32 0.5, %v653_v9  ;;  %v652_v19 = vadd.f32 %v578_v14, %v493_v55  ;;  %v498_v20 = vmax.f32 %v4486_v10, 0.0  ;;  %v402_v21 = vadd.f32 %v401_v17, %v4448_v6  ;;  %v403_v22 = vpop.f32.mrb[15].mxu0 }
 0x115   :  { %v4494_v23 = vmul.f32 0.5, %v651_v13  ;;  %v686_v24 = vmul.f32 0.5, %v654_v15  ;;  %v499_v25 = vmax.f32 %v4490_v16, 0.0  ;;  %v404_v26 = vadd.f32 %v403_v22, %v4450_v8 }
 0x116   :  { %v4498_v27 = vmul.f32 0.5, %v652_v19  ;;  %v500_v28 = vmax.f32 %v402_v21, 0.0  ;;  %v818_v29 = vrot.slane %v816_v0, 5  ;;  %v1470_v30 = vrot.slane %v813_v63, 5 }
 0x117   :  { %v4502_v32 = vpack.c.bf16 %v686_v24, %v685_v18  ;;  %v501_v33 = vmax.f32 %v404_v26, 0.0  ;;  %v1471_v34 = vrot.slane %v816_v0, 6  ;;  %v1478_v38 = vor.u32 %v4482_v5, %v4480_v1 }
 0x118   :  { %v4506_v35 = vpack.c.bf16 %v4498_v27, %v4494_v23  ;;  %v579_v36 = vrot.slane %v500_v28, 4  ;;  %v819_v37 = vor.u32 %v818_v29, %v815_v12 }
 0x119   :  { %v1484_v39 = vshrl.u32 %v4502_v32, 16  ;;  %v582_v40 = vrot.slane %v501_v33, 4  ;;  %v407_v42 = vpop.f32.mrb[16].mxu0  ;;  %v836_v45 = vshll.u32 %v4502_v32, 16  ;;  %v1472_v47 = vor.u32 %v1471_v34, %v1470_v30 }
 0x11a   :  { %v408_v48 = vadd.f32 %v407_v42, %v4448_v6  ;;  %v409_v49 = vpop.f32.mrb[17].mxu0  ;;  %v820_v51 = vrot.slane %v819_v37, 4  ;;  %v827_v52 = vshrl.u32 %v4506_v35, 16  ;;  %v830_v54 = vshll.u32 %v4506_v35, 16 }
 0x11b   :  { %v1486_v55 = vrot.slane %v1484_v39, 5  ;;  %v410_v56 = vadd.f32 %v409_v49, %v4450_v8  ;;  %v411_v57 = vpop.f32.mrb[18].mxu0  ;;  %v838_v58 = vrot.slane %v836_v45, 5  ;;  %v1487_v59 = vrot.slane %v836_v45, 6 }
 0x11c   :  { %v502_v60 = vmax.f32 %v408_v48, 0.0  ;;  %v4523_v61 = vadd.f32 %v411_v57, %v4448_v6  ;;  %v413_v62 = vpop.f32.mrb[19].mxu0  ;;  %v825_v63 = vsel %vm4513_vm7, %v820_v51, %v824_v4  ;;  %v829_v0 = vrot.slane %v827_v52, 4 }
 0x11d   :  { %v503_v1 = vmax.f32 %v410_v56, 0.0  ;;  %v4528_v2 = vadd.f32 %v413_v62, %v4450_v8  ;;  %v832_v3 = vrot.slane %v830_v54, 5  ;;  %v1480_v5 = vrot.slane %v827_v52, 5 }
 0x11e   :  { %v580_v9 = vrot.slane %v502_v60, 4  ;;  %v504_v10 = vmax.f32 %v4523_v61, 0.0  ;;  %v1481_v11 = vrot.slane %v830_v54, 6  ;;  %v1473_v12 = vrot.slane %v1472_v47, 4 }
 0x11f   :  { %v583_v4 = vrot.slane %v503_v1, 4  ;;  %v505_v13 = vmax.f32 %v4528_v2, 0.0  ;;  %v833_v14 = vor.u32 %v832_v3, %v829_v0  ;;  %v1488_v15 = vor.u32 %v1487_v59, %v1486_v55  ;;  %v4066_v55 = vld [vmem:[%s5621_s3] sm:$0xff]  }
 0x120   :  { %v581_v16 = vsel %vm566_vm2, %v579_v36, %v580_v9  ;;  %v657_v17 = vadd.f32 %v580_v9, %v500_v28  ;;  %v1479_v18 = vsel %vm4532_vm9, %v1473_v12, %v1478_v38  ;;  %v1482_v19 = vor.u32 %v1481_v11, %v1480_v5 }
 0x121   :  { %v655_v21 = vadd.f32 %v581_v16, %v498_v20  ;;  %v584_v22 = vsel %vm566_vm2, %v582_v40, %v583_v4  ;;  %v658_v24 = vadd.f32 %v583_v4, %v501_v33  ;;  %v417_v26 = vpop.f32.mrb[20].mxu0  ;;  %v834_v29 = vrot.slane %v833_v14, 4  ;;  %v4067_v16 = vld [vmem:[%s5621_s3 + $0x8] sm:$0xff]  }
 0x122   :  { %v689_v30 = vmul.f32 0.5, %v657_v17  ;;  %v656_v34 = vadd.f32 %v584_v22, %v499_v25  ;;  %v418_v37 = vadd.f32 %v417_v26, %v4448_v6  ;;  %v419_v39 = vpop.f32.mrb[21].mxu0  ;;  %v1483_v42 = vrot.slane %v1482_v19, 4 }
 0x123   :  { %v4543_v45 = vmul.f32 0.5, %v655_v21  ;;  %v690_v36 = vmul.f32 0.5, %v658_v24  ;;  %v420_v28 = vadd.f32 %v419_v39, %v4450_v8  ;;  %v421_v47 = vpop.f32.mrb[22].mxu0  ;;  %v839_v20 = vsel %vm4513_vm7, %v834_v29, %v838_v58 }
 0x124   :  { %v4548_v38 = vmul.f32 0.5, %v656_v34  ;;  %v506_v33 = vmax.f32 %v418_v37, 0.0  ;;  %v422_v40 = vadd.f32 %v421_v47, %v4448_v6  ;;  %v423_v48 = vpop.f32.mrb[23].mxu0  ;;  %v3303_v25 = vcombine.low %v825_v63, %v839_v20 }
 0x125   :  { %v4551_v49 = vpack.c.bf16 %v690_v36, %v689_v30  ;;  %v507_v51 = vmax.f32 %v420_v28, 0.0  ;;  %v424_v52 = vadd.f32 %v423_v48, %v4450_v8  ;;  %v3304_v54 = vcombine.high %v825_v63, %v839_v20 }
 0x126   :  { %v4559_v56 = vpack.c.bf16 %v4548_v38, %v4543_v45  ;;  %v585_v57 = vrot.slane %v506_v33, 4  ;;  %v508_v58 = vmax.f32 %v422_v40, 0.0  ;;  %v1489_v59 = vsel %vm4532_vm9, %v1483_v42, %v1488_v15 }
 0x127   :  { %v850_v60 = vshll.u32 %v4551_v49, 16  ;;  %v1494_v62 = vshrl.u32 %v4551_v49, 16  ;;  %v588_v0 = vrot.slane %v507_v51, 4  ;;  %v509_v1 = vmax.f32 %v424_v52, 0.0  ;;  %3320 = vmatprep.mubr.msk.bf16.mxu1 %vm1025_vm8, %v3304_v54 }
 0x128   :  { %v586_v63 = vrot.slane %v508_v58, 4  ;;  %v3410_v3 = vcombine.low %v1479_v18, %v1489_v59  ;;  %v3411_v5 = vcombine.high %v1479_v18, %v1489_v59  ;;  %1071 = vmatmul.mubr.bf16.vlgmr.msra.gmra.mrb[0].mxu1 %v3303_v25  ;;  %v841_v9 = vshrl.u32 %v4559_v56, 16 }
 0x129   :  { %v4567_v11 = vrot.slane %v1494_v62, 5  ;;  %v589_v12 = vrot.slane %v509_v1, 4  ;;  %v427_v4 = vpop.f32.mrb[24].mxu0  ;;  %v844_v14 = vshll.u32 %v4559_v56, 16  ;;  %v852_v15 = vrot.slane %v850_v60, 5  ;;  %1182 = vmatpush1.bf16.msra.mxu1 %v4066_v55 }
 0x12a   :  { %v587_v17 = vsel %vm566_vm2, %v585_v57, %v586_v63  ;;  %v661_v19 = vadd.f32 %v586_v63, %v506_v33  ;;  %3427 = vmatprep.mubr.msk.bf16.mxu0 %vm1025_vm8, %v3411_v5  ;;  %v4576_v18 = vadd.f32 %v427_v4, %v4448_v6  ;;  %v429_v21 = vpop.f32.mrb[25].mxu0  ;;  %v843_v22 = vrot.slane %v841_v9, 4  ;;  %1183 = vmatprep.subr.bf16.mxu1 %v5631_v44  ;;  %v4068_v33 = vld [vmem:[%s5621_s3 + $0x10] sm:$0xff]  }
 0x12b   :  { %v659_v24 = vadd.f32 %v587_v17, %v504_v10  ;;  %v590_v26 = vsel %vm566_vm2, %v588_v0, %v589_v12  ;;  %v662_v29 = vadd.f32 %v589_v12, %v507_v51  ;;  %1696 = vmatmul.mubr.bf16.vlgmr.msra.gmra.mrb[48].mxu0 %v3410_v3  ;;  %v4583_v30 = vadd.f32 %v429_v21, %v4450_v8  ;;  %v431_v34 = vpop.f32.mrb[26].mxu0 }
 0x12c   :  { %v693_v37 = vmul.f32 0.5, %v661_v19  ;;  %v660_v39 = vadd.f32 %v590_v26, %v505_v13  ;;  %v510_v42 = vmax.f32 %v4576_v18, 0.0  ;;  %v432_v36 = vadd.f32 %v431_v34, %v4448_v6  ;;  %v433_v28 = vpop.f32.mrb[27].mxu0 }
 0x12d   :  { %v4589_v47 = vmul.f32 0.5, %v659_v24  ;;  %v694_v61 = vmul.f32 0.5, %v662_v29  ;;  %v511_v10 = vmax.f32 %v4583_v30, 0.0  ;;  %v434_v20 = vadd.f32 %v433_v28, %v4450_v8  ;;  %1184 = vmatpush1.bf16.msra.mxu1 %v4067_v16 }
 0x12e   :  { %v4596_v40 = vmul.f32 0.5, %v660_v39  ;;  %v512_v2 = vmax.f32 %v432_v36, 0.0  ;;  %v846_v13 = vrot.slane %v844_v14, 5  ;;  %v1490_v48 = vrot.slane %v841_v9, 5  ;;  %1185 = vmatprep.subr.bf16.mxu1 %v5631_v44 }
 0x12f   :  { %v4599_v25 = vpack.c.bf16 %v694_v61, %v693_v37  ;;  %v513_v51 = vmax.f32 %v434_v20, 0.0  ;;  %v1491_v52 = vrot.slane %v844_v14, 6  ;;  %v1497_v54 = vrot.slane %v850_v60, 6  ;;  %v4069_v60 = vld [vmem:[%s5621_s3 + $0x18] sm:$0xff]   ;;  %v4070_v20 = vld [vmem:[%s5621_s3 + $0x20] sm:$0xff]  }
 0x130   :  { %v4603_v55 = vpack.c.bf16 %v4596_v40, %v4589_v47  ;;  %v591_v57 = vrot.slane %v512_v2, 4  ;;  %v847_v58 = vor.u32 %v846_v13, %v843_v22  ;;  %v3691_v59 = vpack.c.bf16 %v4498_v27, %v4466_v46 }
 0x131   :  { %v864_v62 = vshll.u32 %v4599_v25, 16  ;;  %v1504_v0 = vshrl.u32 %v4599_v25, 16  ;;  %v594_v1 = vrot.slane %v513_v51, 4  ;;  %v437_v63 = vpop.f32.mrb[28].mxu0  ;;  %v1492_v3 = vor.u32 %v1491_v52, %v1490_v48  ;;  %1186 = vmatpush1.bf16.msra.mxu1 %v4068_v33 }
 0x132   :  { %v438_v5 = vadd.f32 %v437_v63, %v4448_v6  ;;  %v439_v9 = vpop.f32.mrb[29].mxu0  ;;  %v848_v12 = vrot.slane %v847_v58, 4  ;;  %v855_v4 = vshrl.u32 %v4603_v55, 16  ;;  %v858_v14 = vshll.u32 %v4603_v55, 16  ;;  %1187 = vmatprep.subr.bf16.mxu1 %v5631_v44 }
 0x133   :  { %v4616_v16 = vrot.slane %v1504_v0, 5  ;;  %v440_v17 = vadd.f32 %v439_v9, %v4450_v8  ;;  %v441_v19 = vpop.f32.mrb[30].mxu0  ;;  %v866_v21 = vrot.slane %v864_v62, 5  ;;  %v1493_v22 = vrot.slane %v1492_v3, 4 }
 0x134   :  { %v514_v24 = vmax.f32 %v438_v5, 0.0  ;;  %v4620_v26 = vadd.f32 %v441_v19, %v4448_v6  ;;  %v443_v29 = vpop.f32.mrb[31].mxu0  ;;  %v4624_v34 = vsel %vm4513_vm7, %v848_v12, %v852_v15  ;;  %v857_v37 = vrot.slane %v855_v4, 4 }
 0x135   :  { %v515_v39 = vmax.f32 %v440_v17, 0.0  ;;  %v4627_v36 = vadd.f32 %v443_v29, %v4450_v8  ;;  %v860_v28 = vrot.slane %v858_v14, 5  ;;  %v1498_v61 = vor.u32 %v1497_v54, %v4567_v11  ;;  %1188 = vmatpush1.bf16.msra.mxu1 %v4069_v60  ;;  %v4071_v17 = vld [vmem:[%s5621_s3 + $0x28] sm:$0xff]  }
 0x136   :  { %v592_v33 = vrot.slane %v514_v24, 4  ;;  %v516_v13 = vmax.f32 %v4620_v26, 0.0  ;;  %v1500_v48 = vrot.slane %v855_v4, 5  ;;  %v1501_v52 = vrot.slane %v858_v14, 6  ;;  %1189 = vmatprep.subr.bf16.mxu1 %v5631_v44 }
 0x137   :  { %v595_v15 = vrot.slane %v515_v39, 4  ;;  %v517_v58 = vmax.f32 %v4627_v36, 0.0  ;;  %v861_v0 = vor.u32 %v860_v28, %v857_v37  ;;  %v4638_v63 = vsel %vm4532_vm9, %v1493_v22, %v1498_v61 }
 0x138   :  { %v593_v11 = vsel %vm566_vm2, %v591_v57, %v592_v33  ;;  %v665_v54 = vadd.f32 %v592_v33, %v512_v2  ;;  %v1502_v3 = vor.u32 %v1501_v52, %v1500_v48  ;;  %v1507_v60 = vrot.slane %v864_v62, 6 }
 0x139   :  { %v663_v5 = vadd.f32 %v593_v11, %v510_v42  ;;  %v596_v9 = vsel %vm566_vm2, %v594_v1, %v595_v15  ;;  %v666_v12 = vadd.f32 %v595_v15, %v513_v51  ;;  %v447_v4 = vpop.f32.mrb[32].mxu0  ;;  %v862_v14 = vrot.slane %v861_v0, 4  ;;  %1190 = vmatpush1.bf16.msra.mxu1 %v4070_v20 }
 0x13a   :  { %v697_v19 = vmul.f32 0.5, %v665_v54  ;;  %v664_v57 = vadd.f32 %v596_v9, %v511_v10  ;;  %v448_v2 = vadd.f32 %v447_v4, %v4448_v6  ;;  %v449_v62 = vpop.f32.mrb[33].mxu0  ;;  %v1503_v22 = vrot.slane %v1502_v3, 4  ;;  %1191 = vmatprep.subr.bf16.mxu1 %v5631_v44 }
 0x13b   :  { %v4651_v18 = vmul.f32 0.5, %v663_v5  ;;  %v698_v42 = vmul.f32 0.5, %v666_v12  ;;  %v450_v51 = vadd.f32 %v449_v62, %v4450_v8  ;;  %v451_v1 = vpop.f32.mrb[34].mxu0  ;;  %v867_v24 = vsel %vm4513_vm7, %v862_v14, %v866_v21  ;;  %v4072_v21 = vld [vmem:[%s5621_s3 + $0x30] sm:$0xff]  }
 0x13c   :  { %v4656_v29 = vmul.f32 0.5, %v664_v57  ;;  %v518_v37 = vmax.f32 %v448_v2, 0.0  ;;  %v452_v30 = vadd.f32 %v451_v1, %v4448_v6  ;;  %v453_v10 = vpop.f32.mrb[35].mxu0  ;;  %v3306_v39 = vcombine.high %v4624_v34, %v867_v24  ;;  %v4073_v57 = vld [vmem:[%s5621_s3 + $0x38] sm:$0xff]  }
 0x13d   :  { %v4660_v28 = vpack.c.bf16 %v698_v42, %v697_v19  ;;  %v519_v61 = vmax.f32 %v450_v51, 0.0  ;;  %v454_v20 = vadd.f32 %v453_v10, %v4450_v8  ;;  %v1508_v33 = vor.u32 %v1507_v60, %v4616_v16  ;;  %1192 = vmatpush1.bf16.msra.mxu1 %v4071_v17 }
 0x13e   :  { %v4669_v48 = vpack.c.bf16 %v4656_v29, %v4651_v18  ;;  %v597_v52 = vrot.slane %v518_v37, 4  ;;  %v520_v15 = vmax.f32 %v452_v30, 0.0  ;;  %3321 = vmatprep.mubr.msk.bf16.mxu1 %vm1025_vm8, %v3306_v39  ;;  %v3305_v0 = vcombine.low %v4624_v34, %v867_v24  ;;  %1193 = vmatprep.subr.bf16.mxu1 %v5631_v44 }
 0x13f   :  { %v878_v11 = vshll.u32 %v4660_v28, 16  ;;  %v1514_v16 = vshrl.u32 %v4660_v28, 16  ;;  %v600_v54 = vrot.slane %v519_v61, 4  ;;  %v521_v3 = vmax.f32 %v454_v20, 0.0 }
 0x140   :  { %v598_v60 = vrot.slane %v520_v15, 4  ;;  %v1509_v5 = vsel %vm4532_vm9, %v1503_v22, %v1508_v33  ;;  %1079 = vmatmul.mubr.bf16.gmra.mrb[4].mxu1 %v3305_v0  ;;  %v869_v9 = vshrl.u32 %v4669_v48, 16  ;;  %v872_v12 = vshll.u32 %v4669_v48, 16  ;;  %v4074_v15 = vld [vmem:[%s5621_s3 + $0x40] sm:$0xff]  }
 0x141   :  { %v4680_v4 = vrot.slane %v1514_v16, 5  ;;  %v601_v34 = vrot.slane %v521_v3, 4  ;;  %v3413_v14 = vcombine.high %v4638_v63, %v1509_v5  ;;  %v3412_v17 = vcombine.low %v4638_v63, %v1509_v5  ;;  %v457_v19 = vpop.f32.mrb[36].mxu0  ;;  %1194 = vmatpush1.bf16.msra.mxu1 %v4072_v21 }
 0x142   :  { %v599_v2 = vsel %vm566_vm2, %v597_v52, %v598_v60  ;;  %v669_v62 = vadd.f32 %v598_v60, %v518_v37  ;;  %v4689_v22 = vadd.f32 %v457_v19, %v4448_v6  ;;  %v459_v42 = vpop.f32.mrb[37].mxu0  ;;  %v871_v51 = vrot.slane %v869_v9, 4  ;;  %1195 = vmatprep.subr.bf16.mxu1 %v5631_v44 }
 0x143   :  { %v667_v1 = vadd.f32 %v599_v2, %v516_v13  ;;  %v602_v63 = vsel %vm566_vm2, %v600_v54, %v601_v34  ;;  %v670_v24 = vadd.f32 %v601_v34, %v519_v61  ;;  %3428 = vmatprep.mubr.msk.bf16.mxu0 %vm1025_vm8, %v3413_v14  ;;  %v4697_v30 = vadd.f32 %v459_v42, %v4450_v8  ;;  %v461_v10 = vpop.f32.mrb[38].mxu0 }
 0x144   :  { %v701_v37 = vmul.f32 0.5, %v669_v62  ;;  %v668_v39 = vadd.f32 %v602_v63, %v517_v58  ;;  %1704 = vmatmul.mubr.bf16.gmra.mrb[52].mxu0 %v3412_v17  ;;  %v522_v20 = vmax.f32 %v4689_v22, 0.0  ;;  %v462_v33 = vadd.f32 %v461_v10, %v4448_v6  ;;  %v463_v26 = vpop.f32.mrb[39].mxu0 }
 0x145   :  { %v4703_v13 = vmul.f32 0.5, %v667_v1  ;;  %v702_v21 = vmul.f32 0.5, %v670_v24  ;;  %v523_v61 = vmax.f32 %v4697_v30, 0.0  ;;  %v464_v52 = vadd.f32 %v463_v26, %v4450_v8  ;;  %1196 = vmatpush1.bf16.msra.mxu1 %v4073_v57 }
 0x146   :  { %v4710_v36 = vmul.f32 0.5, %v668_v39  ;;  %v524_v58 = vmax.f32 %v462_v33, 0.0  ;;  %v874_v0 = vrot.slane %v872_v12, 5  ;;  %v880_v16 = vrot.slane %v878_v11, 5  ;;  %1197 = vmatprep.subr.bf16.mxu1 %v5631_v44 }
 0x147   :  { %v4713_v54 = vpack.c.bf16 %v702_v21, %v701_v37  ;;  %v525_v3 = vmax.f32 %v464_v52, 0.0  ;;  %v1510_v60 = vrot.slane %v869_v9, 5  ;;  %v1511_v5 = vrot.slane %v872_v12, 6 }
 0x148   :  { %v4717_v34 = vpack.c.bf16 %v4710_v36, %v4703_v13  ;;  %v603_v14 = vrot.slane %v524_v58, 4  ;;  %v875_v17 = vor.u32 %v874_v0, %v871_v51  ;;  %v1517_v19 = vrot.slane %v878_v11, 6 }
 0x149   :  { %v892_v57 = vshll.u32 %v4713_v54, 16  ;;  %v1524_v2 = vshrl.u32 %v4713_v54, 16  ;;  %v606_v62 = vrot.slane %v525_v3, 4  ;;  %v467_v22 = vpop.f32.mrb[40].mxu0  ;;  %v1512_v42 = vor.u32 %v1511_v5, %v1510_v60  ;;  %1198 = vmatpush1.bf16.msra.mxu1 %v4074_v15 }
 0x14a   :  { %v468_v1 = vadd.f32 %v467_v22, %v4448_v6  ;;  %v469_v63 = vpop.f32.mrb[41].mxu0  ;;  %v876_v9 = vrot.slane %v875_v17, 4  ;;  %v883_v12 = vshrl.u32 %v4717_v34, 16  ;;  %v886_v24 = vshll.u32 %v4717_v34, 16  ;;  %1394 = vmatprep.subr.bf16.mxu1 %v5631_v44 }
 0x14b   :  { %v1526_v51 = vrot.slane %v1524_v2, 5  ;;  %v470_v11 = vadd.f32 %v469_v63, %v4450_v8  ;;  %v471_v30 = vpop.f32.mrb[42].mxu0  ;;  %v894_v10 = vrot.slane %v892_v57, 5  ;;  %v1513_v37 = vrot.slane %v1512_v42, 4 }
 0x14c   :  { %v526_v39 = vmax.f32 %v468_v1, 0.0  ;;  %v4727_v33 = vadd.f32 %v471_v30, %v4448_v6  ;;  %v473_v26 = vpop.f32.mrb[43].mxu0  ;;  %v881_v21 = vsel %vm4513_vm7, %v876_v9, %v880_v16  ;;  %v885_v52 = vrot.slane %v883_v12, 4 }
 0x14d   :  { %v527_v15 = vmax.f32 %v470_v11, 0.0  ;;  %v4732_v0 = vadd.f32 %v473_v26, %v4450_v8  ;;  %v888_v60 = vrot.slane %v886_v24, 5  ;;  %v1518_v5 = vor.u32 %v1517_v19, %v4680_v4 }
 0x14e   :  { %v604_v17 = vrot.slane %v526_v39, 4  ;;  %v528_v2 = vmax.f32 %v4727_v33, 0.0  ;;  %v1520_v22 = vrot.slane %v883_v12, 5  ;;  %v1521_v42 = vrot.slane %v886_v24, 6 }
 0x14f   :  { %v607_v1 = vrot.slane %v527_v15, 4  ;;  %v529_v63 = vmax.f32 %v4732_v0, 0.0  ;;  %v889_v30 = vor.u32 %v888_v60, %v885_v52  ;;  %v1519_v16 = vsel %vm4532_vm9, %v1513_v37, %v1518_v5 }
 0x150   :  { %v605_v9 = vsel %vm566_vm2, %v603_v14, %v604_v17  ;;  %v673_v11 = vadd.f32 %v604_v17, %v524_v58  ;;  %v1522_v26 = vor.u32 %v1521_v42, %v1520_v22  ;;  %v1527_v44 = vrot.slane %v892_v57, 6 }
 0x151   :  { %v671_v31 = vadd.f32 %v605_v9, %v522_v20  ;;  %v608_v4 = vsel %vm566_vm2, %v606_v62, %v607_v1  ;;  %v674_v19 = vadd.f32 %v607_v1, %v525_v3  ;;  %v477_v39 = vpop.f32.mrb[44].mxu0  ;;  %v890_v33 = vrot.slane %v889_v30, 4 }
 0x152   :  { %v705_v12 = vmul.f32 0.5, %v673_v11  ;;  %v672_v24 = vadd.f32 %v608_v4, %v523_v61  ;;  %v478_v15 = vadd.f32 %v477_v39, %v4448_v6  ;;  %v479_v0 = vpop.f32.mrb[45].mxu0  ;;  %v1523_v52 = vrot.slane %v1522_v26, 4 }
 0x153   :  { %v4742_v60 = vmul.f32 0.5, %v671_v31  ;;  %v706_v37 = vmul.f32 0.5, %v674_v19  ;;  %v480_v14 = vadd.f32 %v479_v0, %v4450_v8  ;;  %v481_v58 = vpop.f32.mrb[46].mxu0  ;;  %v895_v20 = vsel %vm4513_vm7, %v890_v33, %v894_v10 }
 0x154   :  { %v4747_v57 = vmul.f32 0.5, %v672_v24  ;;  %v530_v3 = vmax.f32 %v478_v15, 0.0  ;;  %v482_v62 = vadd.f32 %v481_v58, %v4448_v6  ;;  %v483_v5 = vpop.f32.mrb[47].mxu0  ;;  %v3308_v61 = vcombine.high %v881_v21, %v895_v20 }
 0x155   :  { %v4750_v17 = vpack.c.bf16 %v706_v37, %v705_v12  ;;  %v531_v22 = vmax.f32 %v480_v14, 0.0  ;;  %v484_v31 = vadd.f32 %v483_v5, %v4450_v8  ;;  %v1528_v42 = vor.u32 %v1527_v44, %v1526_v51 }
 0x156   :  { %v4755_v1 = vpack.c.bf16 %v4747_v57, %v4742_v60  ;;  %v609_v30 = vrot.slane %v530_v3, 4  ;;  %v532_v9 = vmax.f32 %v482_v62, 0.0  ;;  %3322 = vmatprep.mubr.msk.bf16.mxu1 %vm1025_vm8, %v3308_v61  ;;  %v3307_v10 = vcombine.low %v881_v21, %v895_v20 }
 0x157   :  { %v906_v11 = vshll.u32 %v4750_v17, 16  ;;  %v1534_v6 = vshrl.u32 %v4750_v17, 16  ;;  %v612_v26 = vrot.slane %v531_v22, 4  ;;  %v533_v4 = vmax.f32 %v484_v31, 0.0 }
 0x158   :  { %v610_v19 = vrot.slane %v532_v9, 4  ;;  %v1529_v8 = vsel %vm4532_vm9, %v1523_v52, %v1528_v42  ;;  %1087 = vmatmul.mubr.bf16.gmra.mrb[8].mxu1 %v3307_v10  ;;  %v897_v44 = vshrl.u32 %v4755_v1, 16  ;;  %v900_v51 = vshll.u32 %v4755_v1, 16 }
 0x159   :  { %v1536_v39 = vrot.slane %v1534_v6, 5  ;;  %v613_v33 = vrot.slane %v533_v4, 4  ;;  %v3415_v12 = vcombine.high %v1519_v16, %v1529_v8  ;;  %v3414_v24 = vcombine.low %v1519_v16, %v1529_v8 }
 0x15a   :  { %v611_v21 = vsel %vm566_vm2, %v609_v30, %v610_v19  ;;  %v677_v15 = vadd.f32 %v610_v19, %v530_v3  ;;  %v899_v0 = vrot.slane %v897_v44, 4  ;;  %v902_v37 = vrot.slane %v900_v51, 5 }
 0x15b   :  { %v675_v14 = vadd.f32 %v611_v21, %v528_v2  ;;  %v614_v58 = vsel %vm566_vm2, %v612_v26, %v613_v33  ;;  %v678_v20 = vadd.f32 %v613_v33, %v531_v22  ;;  %3429 = vmatprep.mubr.msk.bf16.mxu0 %vm1025_vm8, %v3415_v12  ;;  %v908_v52 = vrot.slane %v906_v11, 5 }
 0x15c   :  { %v709_v62 = vmul.f32 0.5, %v677_v15  ;;  %v676_v5 = vadd.f32 %v614_v58, %v529_v63  ;;  %1712 = vmatmul.mubr.bf16.gmra.mrb[56].mxu0 %v3414_v24  ;;  %v903_v61 = vor.u32 %v902_v37, %v899_v0  ;;  %v1530_v31 = vrot.slane %v897_v44, 5 }
 0x15d   :  { %v4767_v42 = vmul.f32 0.5, %v675_v14  ;;  %v710_v16 = vmul.f32 0.5, %v678_v20  ;;  %v1531_v9 = vrot.slane %v900_v51, 6  ;;  %v1537_v30 = vrot.slane %v906_v11, 6 }
 0x15e   :  { %v4769_v3 = vmul.f32 0.5, %v676_v5  ;;  %v904_v10 = vrot.slane %v903_v61, 4  ;;  %v3693_v2 = vpack.c.bf16 %v4596_v40, %v4548_v38  ;;  %v3692_v22 = vpack.c.bf16 %v4589_v47, %v4543_v45  ;;  %v4077_v38 = vld [vmem:[%s5621_s3 + $0xa0] sm:$0xff]   ;;  %v4078_v40 = vld [vmem:[%s5621_s3 + $0xa8] sm:$0xff]  }
 0x15f   :  { %v4775_v6 = vpack.c.bf16 %v710_v16, %v709_v62  ;;  %v1532_v63 = vor.u32 %v1531_v9, %v1530_v31  ;;  %v1538_v26 = vor.u32 %v1537_v30, %v1536_v39  ;;  %v3695_v4 = vpack.c.bf16 %v4710_v36, %v4656_v29  ;;  %v4080_v29 = vld [vmem:[%s5621_s3 + $0xb8] sm:$0xff]  }
 0x160   :  { %v4781_v19 = vpack.c.bf16 %v4769_v3, %v4767_v42  ;;  %v909_v11 = vsel %vm4513_vm7, %v904_v10, %v908_v52  ;;  %v3694_v8 = vpack.c.bf16 %v4703_v13, %v4651_v18  ;;  %v3697_v44 = vpack.c.bf16 %v4769_v3, %v4747_v57  ;;  %v4081_v57 = vld [vmem:[%s5621_s3 + $0xc0] sm:$0xff]  }
 0x161   :  { %v920_v51 = vshll.u32 %v4775_v6, 16  ;;  %v1544_v39 = vshrl.u32 %v4775_v6, 16  ;;  %v1533_v33 = vrot.slane %v1532_v63, 4  ;;  %v3696_v12 = vpack.c.bf16 %v4767_v42, %v4742_v60  ;;  %v4084_v42 = vld [vmem:[%s5621_s3 + $0x120] sm:$0xff]  }
 0x162   :  { %v911_v24 = vshrl.u32 %v4781_v19, 16  ;;  %v914_v21 = vshll.u32 %v4781_v19, 16  ;;  %v3348_v61 = vrot.slane %v4603_v55, 9  ;;  %v1263_v31 = vrot.slane %v4599_v25, 5 }
 0x163   :  { %v1546_v15 = vrot.slane %v1544_v39, 5  ;;  %v1539_v0 = vsel %vm4532_vm9, %v1533_v33, %v1538_v26  ;;  %v1547_v37 = vrot.slane %v920_v51, 6  ;;  %v3349_v16 = vrot.slane %v4669_v48, 9 }
 0x164   :  { %v913_v14 = vrot.slane %v911_v24, 4  ;;  %v916_v58 = vrot.slane %v914_v21, 5  ;;  %v1540_v20 = vrot.slane %v911_v24, 5  ;;  %v1541_v52 = vrot.slane %v914_v21, 6 }
 0x165   :  { %v1267_v9 = vrot.slane %v4660_v28, 5  ;;  %v922_v10 = vrot.slane %v920_v51, 5  ;;  %v1548_v26 = vor.u32 %v1547_v37, %v1546_v15  ;;  %v4807_v33 = vsel %vm4801_vm12, %v3348_v61, %v1263_v31 }
 0x166   :  { %v917_v62 = vor.u32 %v916_v58, %v913_v14  ;;  %v1542_v5 = vor.u32 %v1541_v52, %v1540_v20  ;;  %v3350_v15 = vrot.slane %v4717_v34, 9  ;;  %v1271_v52 = vrot.slane %v4713_v54, 5 }
 0x167   :  { %v4811_v24 = vsel %vm4801_vm12, %v3349_v16, %v1267_v9  ;;  %v3352_v61 = vrot.slane %v4781_v19, 9  ;;  %v1279_v43 = vrot.slane %v4775_v6, 5  ;;  %v3434_v46 = vrot.slane %v4603_v55, 10 }
 0x168   :  { %v918_v30 = vrot.slane %v917_v62, 4  ;;  %v1543_v63 = vrot.slane %v1542_v5, 4  ;;  %v3351_v62 = vrot.slane %v4755_v1, 9  ;;  %v1275_v5 = vrot.slane %v4750_v17, 5 }
 0x169   :  { %v4827_v7 = vsel %vm4801_vm12, %v3350_v15, %v1271_v52  ;;  %v4843_v16 = vsel %vm4801_vm12, %v3352_v61, %v1279_v43  ;;  %v1753_v27 = vrot.slane %v4599_v25, 6  ;;  %v1761_v25 = vrot.slane %v4713_v54, 6  ;;  %v4087_v61 = vld [vmem:[%s5621_s3 + $0x138] sm:$0xff]  }
 0x16a   :  { %v923_v21 = vsel %vm4513_vm7, %v918_v30, %v922_v10  ;;  %v1549_v51 = vsel %vm4532_vm9, %v1543_v63, %v1548_v26  ;;  %v3375_v31 = vcombine.low %v4811_v24, %v4827_v7  ;;  %v3435_v10 = vrot.slane %v4669_v48, 10 }
 0x16b   :  { %v3310_v37 = vcombine.high %v909_v11, %v923_v21  ;;  %v3417_v14 = vcombine.high %v1539_v0, %v1549_v51  ;;  %v3309_v58 = vcombine.low %v909_v11, %v923_v21  ;;  %v3416_v20 = vcombine.low %v1539_v0, %v1549_v51  ;;  %v4075_v21 = vld [vmem:[%s5621_s3 + $0x90] sm:$0xff]  }
 0x16c   :  { %v4831_v11 = vsel %vm4801_vm12, %v3351_v62, %v1275_v5  ;;  %v3376_v0 = vcombine.high %v4811_v24, %v4827_v7  ;;  %v1757_v63 = vrot.slane %v4660_v28, 6  ;;  %v3436_v26 = vrot.slane %v4717_v34, 10  ;;  %v4085_v62 = vld [vmem:[%s5621_s3 + $0x128] sm:$0xff]   ;;  %v4086_v5 = vld [vmem:[%s5621_s3 + $0x130] sm:$0xff]  }
 0x16d   :  { %3323 = vmatprep.mubr.msk.bf16.mxu1 %vm1025_vm8, %v3310_v37  ;;  %3430 = vmatprep.mubr.msk.bf16.mxu0 %vm1025_vm8, %v3417_v14  ;;  %v3378_v9 = vcombine.high %v4831_v11, %v4843_v16  ;;  %v3377_v30 = vcombine.low %v4831_v11, %v4843_v16  ;;  %v4864_v55 = vsel %vm4852_vm15, %v3434_v46, %v1753_v27  ;;  %v3437_v51 = vrot.slane %v4755_v1, 10  ;;  %v4089_v46 = vld [vmem:[%s5621_s3 + $0x148] sm:$0xff]  }
 0x16e   :  { %1095 = vmatmul.mubr.bf16.gmra.mrb[12].mxu1 %v3309_v58  ;;  %1720 = vmatmul.mubr.bf16.gmra.mrb[60].mxu0 %v3416_v20  ;;  %v1765_v15 = vrot.slane %v4750_v17, 6  ;;  %v4871_v48 = vsel %vm4852_vm15, %v3435_v10, %v1757_v63  ;;  %v3438_v28 = vrot.slane %v4781_v19, 10  ;;  %v4876_v34 = vsel %vm4852_vm15, %v3436_v26, %v1761_v25 }
 0x16f   :  { %3341 = vmatprep.mubr.msk.bf16.mxu1 %vm1025_vm8, %v3691_v59  ;;  %v1769_v54 = vrot.slane %v4775_v6, 6  ;;  %v5641_v1 = vpack.c.bf16 %v4494_v23, %v4463_v41  ;;  %v3462_v17 = vcombine.high %v4871_v48, %v4876_v34  ;;  %v3461_v19 = vcombine.low %v4871_v48, %v4876_v34  ;;  %v4076_v6 = vld [vmem:[%s5621_s3 + $0x98] sm:$0xff]  }
 0x170   :  { %v4880_v37 = vsel %vm4852_vm15, %v3437_v51, %v1765_v15  ;;  %v5642_v23 = vmov 0   ;;  %v3346_v45 = vrot.slane %v4506_v35, 9  ;;  %v1255_v47 = vrot.slane %v4502_v32, 5 }
 0x171   :  { %v4899_v41 = vsel %vm4852_vm15, %v3438_v28, %v1769_v54  ;;  %v3345_v36 = vrot.slane %v4474_v53, 9  ;;  %v1251_v18 = vrot.slane %v4469_v50, 5  ;;  %v1259_v60 = vrot.slane %v4551_v49, 5 }
 0x172   :  { %v3464_v14 = vcombine.high %v4880_v37, %v4899_v41  ;;  %v3463_v58 = vcombine.low %v4880_v37, %v4899_v41  ;;  %v1256_v13 = vsel %vm4801_vm12, %v3346_v45, %v1255_v47  ;;  %v3432_v43 = vrot.slane %v4506_v35, 10  ;;  %v4094_v41 = vld [vmem:[%s5623_s5] sm:$0xff]  }
 0x173   :  { %v1252_v3 = vsel %vm4801_vm12, %v3345_v36, %v1251_v18  ;;  %v3431_v27 = vrot.slane %v4474_v53, 10  ;;  %v1741_v24 = vrot.slane %v4469_v50, 6  ;;  %v4091_v50 = vld [vmem:[%s5621_s3 + $0x158] sm:$0xff]   ;;  %v4092_v53 = vld [vmem:[%s5621_s3 + $0x160] sm:$0xff]   ;;  %v1749_v11 = vrot.slane %v4551_v49, 6 }
 0x174   :  { %v4099_v36 = vld [vmem:[%s5623_s5 + $0x58] sm:$0xff]   ;;  %vm2053_vm7 = vcmask 1046534   ;;  %vm3161_vm9 = vcmask 687104  }
 0x175   :  { %v1742_v7 = vsel %vm4852_vm15, %v3431_v27, %v1741_v24 }
 0x176   :  { %1214 = vmatmul.mubr.bf16.vlgmr.msra.gmra.mrb[16].mxu1 %v5641_v1 }
 0x177   :  { %1395 = vmatpush1.bf16.msra.mxu1 %v4075_v21  ;;  %3342 = vmatprep.mubr.msk.bf16.mxu1 %vm1025_vm8, %v3693_v2  ;;  %v4079_v2 = vld [vmem:[%s5621_s3 + $0xb0] sm:$0xff]  }
 0x178   :  { %1396 = vmatprep.subr.bf16.mxu1 %v5642_v23 }
 0x17b   :  { %1397 = vmatpush1.bf16.msra.mxu1 %v4076_v6  ;;  %v4093_v6 = vld [vmem:[%s5623_s5 + $0x40] sm:$0xff]  }
 0x17c   :  { %1398 = vmatprep.subr.bf16.mxu1 %v5642_v23 }
 0x17e   :  { %1222 = vmatmul.mubr.bf16.gmra.mrb[20].mxu1 %v3692_v22  ;;  %v3372_v22 = vcombine.high %v1252_v3, %v1256_v13 }
 0x17f   :  { %1399 = vmatpush1.bf16.msra.mxu1 %v4077_v38  ;;  %3343 = vmatprep.mubr.msk.bf16.mxu1 %vm1025_vm8, %v3695_v4  ;;  %v4082_v4 = vld [vmem:[%s5621_s3 + $0xc8] sm:$0xff]  }
 0x180   :  { %1400 = vmatprep.subr.bf16.mxu1 %v5642_v23 }
 0x183   :  { %1401 = vmatpush1.bf16.msra.mxu1 %v4078_v40  ;;  %v4097_v40 = vld [vmem:[%s5623_s5 + $0x50] sm:$0xff]  }
 0x184   :  { %1402 = vmatprep.subr.bf16.mxu1 %v5642_v23 }
 0x186   :  { %1230 = vmatmul.mubr.bf16.gmra.mrb[24].mxu1 %v3694_v8  ;;  %v4083_v8 = vld [vmem:[%s5621_s3 + $0xd0] sm:$0xff]  }
 0x187   :  { %1403 = vmatpush1.bf16.msra.mxu1 %v4079_v2  ;;  %3344 = vmatprep.mubr.msk.bf16.mxu1 %vm1025_vm8, %v3697_v44  ;;  %v3347_v44 = vrot.slane %v4559_v56, 9  ;;  %v4098_v2 = vld [vmem:[%s5623_s5 + $0x10] sm:$0xff]  }
 0x188   :  { %1404 = vmatprep.subr.bf16.mxu1 %v5642_v23 }
 0x189   :  { %v1260_v20 = vsel %vm4801_vm12, %v3347_v44, %v1259_v60  ;;  %v4104_v44 = vld [vmem:[%s5623_s5 + $0x28] sm:$0xff]   ;;  %v4105_v60 = vld [vmem:[%s5623_s5 + $0x70] sm:$0xff]  }
 0x18a   :  { %v3374_v52 = vcombine.high %v1260_v20, %v4807_v33  ;;  %v3373_v39 = vcombine.low %v1260_v20, %v4807_v33  ;;  %v4088_v33 = vld [vmem:[%s5621_s3 + $0x140] sm:$0xff]   ;;  %v4108_v20 = vld [vmem:[%s5623_s5 + $0x38] sm:$0xff]  }
 0x18b   :  { %1405 = vmatpush1.bf16.msra.mxu1 %v4080_v29 }
 0x18c   :  { %1406 = vmatprep.subr.bf16.mxu1 %v5642_v23 }
 0x18e   :  { %1238 = vmatmul.mubr.bf16.gmra.mrb[28].mxu1 %v3696_v12  ;;  %v3371_v12 = vcombine.low %v1252_v3, %v1256_v13  ;;  %v4100_v13 = vld [vmem:[%s5623_s5 + $0x18] sm:$0xff]  }
 0x18f   :  { %1407 = vmatpush1.bf16.msra.mxu1 %v4081_v57  ;;  %3388 = vmatprep.mubr.msk.bf16.mxu1 %vm1025_vm8, %v3372_v22  ;;  %v4101_v22 = vld [vmem:[%s5623_s5 + $0x60] sm:$0xff]  }
 0x190   :  { %1408 = vmatprep.subr.bf16.mxu1 %v5642_v23 }
 0x193   :  { %1409 = vmatpush1.bf16.msra.mxu1 %v4082_v4  ;;  %v4102_v4 = vld [vmem:[%s5623_s5 + $0x20] sm:$0xff]  }
 0x194   :  { %1410 = vmatprep.subr.bf16.mxu1 %v5642_v23 }
 0x197   :  { %1411 = vmatpush1.bf16.msra.mxu1 %v4083_v8  ;;  %v4103_v8 = vld [vmem:[%s5623_s5 + $0x68] sm:$0xff]  }
 0x198   :  { %1884 = vmatprep.subr.bf16.mxu1 %v5642_v23 }
 0x19a   :  { %1427 = vmatmul.mubr.bf16.vlgmr.msra.gmra.mrb[32].mxu1 %v3371_v12  ;;  %v4107_v12 = vld [vmem:[%s5623_s5 + $0x78] sm:$0xff]  }
 0x19b   :  { %3389 = vmatprep.mubr.msk.bf16.mxu1 %vm1025_vm8, %v3374_v52  ;;  %1885 = vmatpush1.bf16.msra.mxu1 %v4084_v42  ;;  %v4106_v42 = vld [vmem:[%s5623_s5 + $0x30] sm:$0xff]  }
 0x19c   :  { %1886 = vmatprep.subr.bf16.mxu1 %v5642_v23 }
 0x19f   :  { %1887 = vmatpush1.bf16.msra.mxu1 %v4085_v62 }
 0x1a0   :  { %1888 = vmatprep.subr.bf16.mxu1 %v5642_v23 }
 0x1a2   :  { %1435 = vmatmul.mubr.bf16.gmra.mrb[36].mxu1 %v3373_v39 }
 0x1a3   :  { %3390 = vmatprep.mubr.msk.bf16.mxu1 %vm1025_vm8, %v3376_v0  ;;  %1889 = vmatpush1.bf16.msra.mxu1 %v4086_v5  ;;  %v1745_v0 = vrot.slane %v4502_v32, 6  ;;  %v4090_v32 = vld [vmem:[%s5621_s3 + $0x150] sm:$0xff]  }
 0x1a4   :  { %1890 = vmatprep.subr.bf16.mxu1 %v5642_v23 }
 0x1a5   :  { %v1746_v35 = vsel %vm4852_vm15, %v3432_v43, %v1745_v0 }
 0x1a6   :  { %v3457_v16 = vcombine.low %v1742_v7, %v1746_v35 }
 0x1a7   :  { %1891 = vmatpush1.bf16.msra.mxu1 %v4087_v61 }
 0x1a8   :  { %1892 = vmatprep.subr.bf16.mxu1 %v5642_v23 }
 0x1aa   :  { %1443 = vmatmul.mubr.bf16.gmra.mrb[40].mxu1 %v3375_v31  ;;  %v3458_v31 = vcombine.high %v1742_v7, %v1746_v35 }
 0x1ab   :  { %3391 = vmatprep.mubr.msk.bf16.mxu1 %vm1025_vm8, %v3378_v9  ;;  %1893 = vmatpush1.bf16.msra.mxu1 %v4088_v33  ;;  %v3433_v9 = vrot.slane %v4559_v56, 10 }
 0x1ac   :  { %1894 = vmatprep.subr.bf16.mxu1 %v5642_v23 }
 0x1af   :  { %1895 = vmatpush1.bf16.msra.mxu1 %v4089_v46 }
 0x1b0   :  { %1896 = vmatprep.subr.bf16.mxu1 %v5642_v23 }
 0x1b2   :  { %1451 = vmatmul.mubr.bf16.gmra.mrb[44].mxu1 %v3377_v30  ;;  %v1750_v30 = vsel %vm4852_vm15, %v3433_v9, %v1749_v11 }
 0x1b3   :  { %1897 = vmatpush1.bf16.msra.mxu1 %v4090_v32  ;;  %3474 = vmatprep.mubr.msk.bf16.mxu1 %vm1025_vm8, %v3458_v31  ;;  %v3460_v10 = vcombine.high %v1750_v30, %v4864_v55  ;;  %v3459_v63 = vcombine.low %v1750_v30, %v4864_v55 }
 0x1b4   :  { %1898 = vmatprep.subr.bf16.mxu1 %v5642_v23 }
 0x1b7   :  { %1899 = vmatpush1.bf16.msra.mxu1 %v4091_v50 }
 0x1b8   :  { %1900 = vmatprep.subr.bf16.mxu1 %v5642_v23  ;;  %v4095_v23 = vld [vmem:[%s5623_s5 + $0x48] sm:$0xff]  }
 0x1bb   :  { %1901 = vmatpush1.bf16.msra.mxu1 %v4092_v53 }
 0x1be   :  { %1917 = vmatmul.mubr.bf16.vlgmr.msra.gmra.mrb[48].mxu1 %v3457_v16 }
 0x1bf   :  { %3475 = vmatprep.mubr.msk.bf16.mxu1 %vm1025_vm8, %v3460_v10 }
 0x1c6   :  { %1925 = vmatmul.mubr.bf16.gmra.mrb[52].mxu1 %v3459_v63 }
 0x1c7   :  { %3476 = vmatprep.mubr.msk.bf16.mxu1 %vm1025_vm8, %v3462_v17 }
 0x1ce   :  { %1933 = vmatmul.mubr.bf16.gmra.mrb[56].mxu1 %v3461_v19  ;;  %v4172_v19 = vmov 0.0  }
 0x1cf   :  { %3477 = vmatprep.mubr.msk.bf16.mxu1 %vm1025_vm8, %v3464_v14  ;;  %3786 = vmatprep.subr.bf16.mxu0 %v4172_v19  ;;  %v4096_v14 = vld [vmem:[%s5623_s5 + $0x8] sm:$0xff]   ;;  %vm2056_vm8 = vcmask 1047559  }
 0x1d0   :  { %3806 = vmatprep.subr.bf16.mxu1 %v4172_v19  ;;  %3787 = vmatpush3.bf16.msra.mxu0 %v4093_v6 }
 0x1d1   :  { %3807 = vmatpush3.bf16.msra.mxu1 %v4094_v41  ;;  %3788 = vmatprep.subr.bf16.mxu0 %v4172_v19 }
 0x1d2   :  { %3808 = vmatprep.subr.bf16.mxu1 %v4172_v19  ;;  %3802 = vmatprep.mubr.msk.bf16.mxu0 %vm4173_vm0, %v4172_v19 }
 0x1d4   :  { %3789 = vmatpush3.bf16.msra.mxu0 %v4095_v23 }
 0x1d5   :  { %3809 = vmatpush3.bf16.msra.mxu1 %v4096_v14  ;;  %3790 = vmatprep.subr.bf16.mxu0 %v4172_v19 }
 0x1d6   :  { %1941 = vmatmul.mubr.bf16.gmra.mrb[60].mxu1 %v3463_v58  ;;  %3810 = vmatprep.subr.bf16.mxu1 %v4172_v19 }
 0x1d7   :  { %3822 = vmatprep.mubr.msk.bf16.mxu1 %vm4173_vm0, %v4172_v19 }
 0x1d8   :  { %3791 = vmatpush3.bf16.msra.mxu0 %v4097_v40 }
 0x1d9   :  { %3811 = vmatpush3.bf16.msra.mxu1 %v4098_v2  ;;  %3792 = vmatprep.subr.bf16.mxu0 %v4172_v19 }
 0x1da   :  { %3812 = vmatprep.subr.bf16.mxu1 %v4172_v19 }
 0x1dc   :  { %3793 = vmatpush3.bf16.msra.mxu0 %v4099_v36 }
 0x1dd   :  { %3813 = vmatpush3.bf16.msra.mxu1 %v4100_v13  ;;  %3794 = vmatprep.subr.bf16.mxu0 %v4172_v19 }
 0x1de   :  { %3814 = vmatprep.subr.bf16.mxu1 %v4172_v19 }
 0x1e0   :  { %3795 = vmatpush3.bf16.msra.mxu0 %v4101_v22 }
 0x1e1   :  { %3815 = vmatpush3.bf16.msra.mxu1 %v4102_v4  ;;  %3796 = vmatprep.subr.bf16.mxu0 %v4172_v19 }
 0x1e2   :  { %3816 = vmatprep.subr.bf16.mxu1 %v4172_v19 }
 0x1e4   :  { %3797 = vmatpush3.bf16.msra.mxu0 %v4103_v8 }
 0x1e5   :  { %3817 = vmatpush3.bf16.msra.mxu1 %v4104_v44  ;;  %3798 = vmatprep.subr.bf16.mxu0 %v4172_v19 }
 0x1e6   :  { %3818 = vmatprep.subr.bf16.mxu1 %v4172_v19 }
 0x1e8   :  { %3799 = vmatpush3.bf16.msra.mxu0 %v4105_v60 }
 0x1e9   :  { %3819 = vmatpush3.bf16.msra.mxu1 %v4106_v42  ;;  %3800 = vmatprep.subr.bf16.mxu0 %v4172_v19 }
 0x1ea   :  { %3820 = vmatprep.subr.bf16.mxu1 %v4172_v19 }
 0x1ec   :  { %3801 = vmatpush3.bf16.msra.mxu0 %v4107_v12 }
 0x1ed   :  { %3821 = vmatpush3.bf16.msra.mxu1 %v4108_v20  ;;  %3826 = vmatprep.subr.bf16.mxu0 %v4172_v19 }
 0x1ee   :  { %3846 = vmatprep.subr.bf16.mxu1 %v4172_v19 }
 0x1fb   :  { %v5047_v49 = vpop.f32.mrb[0].mxu1 }
 0x1fc   :  { %v1074_v56 = vpop.f32.mrb[1].mxu1 }
 0x1fd   :  { %v5049_v59 = vpop.f32.mrb[2].mxu1 }
 0x1fe   :  { %v5051_v26 = vpop.f32.mrb[48].mxu0  ;;  %v1077_v21 = vpop.f32.mrb[3].mxu1 }
 0x1ff   :  { %v1699_v55 = vpop.f32.mrb[49].mxu0 }
 0x200   :  { %v5053_v25 = vpop.f32.mrb[50].mxu0 }
 0x201   :  { %v1702_v51 = vpop.f32.mrb[51].mxu0 }
 0x213   :  { %v5055_v15 = vpop.f32.mrb[4].mxu1 }
 0x214   :  { %v1082_v48 = vpop.f32.mrb[5].mxu1 }
 0x215   :  { %v5057_v28 = vpop.f32.mrb[6].mxu1 }
 0x216   :  { %v1085_v34 = vpop.f32.mrb[7].mxu1 }
 0x217   :  { %v5059_v37 = vpop.f32.mrb[52].mxu0 }
 0x218   :  { %v1707_v54 = vpop.f32.mrb[53].mxu0 }
 0x219   :  { %v5061_v1 = vpop.f32.mrb[54].mxu0 }
 0x21a   :  { %v1710_v17 = vpop.f32.mrb[55].mxu0 }
 0x22b   :  { %v5079_v58 = vpop.f32.mrb[8].mxu1 }
 0x22c   :  { %v1090_v38 = vpop.f32.mrb[9].mxu1 }
 0x22d   :  { %v5088_v45 = vpop.f32.mrb[10].mxu1 }
 0x22e   :  { %v1093_v47 = vpop.f32.mrb[11].mxu1 }
 0x22f   :  { %v5091_v29 = vpop.f32.mrb[56].mxu0 }
 0x230   :  { %v1715_v18 = vpop.f32.mrb[57].mxu0 }
 0x231   :  { %v5100_v57 = vpop.f32.mrb[58].mxu0 }
 0x232   :  { %v1718_v3 = vpop.f32.mrb[59].mxu0 }
 0x241   :  { %v1096_v52 = vpop.f32.mrb[12].mxu1  ;;  %v5138_v62 = vpop.f32.mrb[60].mxu0 }
 0x242   :  { %v1098_v5 = vpop.f32.mrb[13].mxu1  ;;  %v1723_v39 = vpop.f32.mrb[61].mxu0 }
 0x243   :  { %v1099_v61 = vpop.f32.mrb[14].mxu1  ;;  %v1724_v33 = vpop.f32.mrb[62].mxu0 }
 0x244   :  { %v1101_v43 = vpop.f32.mrb[15].mxu1  ;;  %v1726_v0 = vpop.f32.mrb[63].mxu0 }
 0x245   :  { %v5165_v43 = vld [vmem:[%s5624_s4] ss:$0 sm:$0xff] }
 0x249   :  { %v1215_v46 = vpop.f32.mrb[16].mxu1 }
 0x24a   :  { %v1216_v27 = vadd.f32 %v1215_v46, %v5047_v49  ;;  %v1217_v24 = vpop.f32.mrb[17].mxu1 }
 0x24b   :  { %v1218_v35 = vpop.f32.mrb[18].mxu1 }
 0x24c   :  { %v1219_v32 = vadd.f32 %v1218_v35, %v5049_v59  ;;  %v1220_v7 = vpop.f32.mrb[19].mxu1 }
 0x251   :  { %v1223_v31 = vpop.f32.mrb[20].mxu1 }
 0x252   :  { %v1224_v50 = vadd.f32 %v1223_v31, %v5055_v15  ;;  %v1225_v53 = vpop.f32.mrb[21].mxu1 }
 0x253   :  { %v1226_v9 = vpop.f32.mrb[22].mxu1 }
 0x254   :  { %v1227_v11 = vadd.f32 %v1226_v9, %v5057_v28  ;;  %v1228_v16 = vpop.f32.mrb[23].mxu1 }
 0x259   :  { %v1231_v30 = vpop.f32.mrb[24].mxu1 }
 0x25a   :  { %v1232_v10 = vadd.f32 %v1231_v30, %v5079_v58  ;;  %v1233_v63 = vpop.f32.mrb[25].mxu1 }
 0x25b   :  { %v1234_v56 = vpop.f32.mrb[26].mxu1 }
 0x25c   :  { %v1235_v49 = vadd.f32 %v1234_v56, %v5088_v45  ;;  %v1236_v21 = vpop.f32.mrb[27].mxu1 }
 0x261   :  { %v1239_v55 = vpop.f32.mrb[28].mxu1 }
 0x262   :  { %v1240_v51 = vadd.f32 %v1239_v55, %v1096_v52  ;;  %v1241_v59 = vpop.f32.mrb[29].mxu1 }
 0x263   :  { %v1242_v48 = vpop.f32.mrb[30].mxu1 }
 0x264   :  { %v1243_v34 = vadd.f32 %v1242_v48, %v1099_v61  ;;  %v1244_v54 = vpop.f32.mrb[31].mxu1 }
 0x26d   :  { %v1428_v15 = vpop.f32.mrb[32].mxu1 }
 0x26e   :  { %v1459_v17 = vadd.f32 %v1428_v15, %v1216_v27  ;;  %v1430_v6 = vpop.f32.mrb[33].mxu1 }
 0x26f   :  { %v1431_v41 = vpop.f32.mrb[34].mxu1 }
 0x270   :  { %v1460_v28 = vadd.f32 %v1431_v41, %v1219_v32  ;;  %v1433_v23 = vpop.f32.mrb[35].mxu1  ;;  %v1728_v14 = vadd.f32 %v5051_v26, %v1459_v17 }
 0x272   :  { %v1729_v58 = vadd.f32 %v5053_v25, %v1460_v28 }
 0x275   :  { %v1436_v38 = vpop.f32.mrb[36].mxu1 }
 0x276   :  { %v1461_v40 = vadd.f32 %v1436_v38, %v1224_v50  ;;  %v1438_v2 = vpop.f32.mrb[37].mxu1 }
 0x277   :  { %v1439_v45 = vpop.f32.mrb[38].mxu1 }
 0x278   :  { %v1462_v47 = vadd.f32 %v1439_v45, %v1227_v11  ;;  %v1441_v36 = vpop.f32.mrb[39].mxu1  ;;  %v1730_v18 = vadd.f32 %v5059_v37, %v1461_v40 }
 0x27a   :  { %v1731_v13 = vadd.f32 %v5061_v1, %v1462_v47 }
 0x27d   :  { %v1444_v3 = vpop.f32.mrb[40].mxu1 }
 0x27e   :  { %v1463_v22 = vadd.f32 %v1444_v3, %v1232_v10  ;;  %v1446_v4 = vpop.f32.mrb[41].mxu1 }
 0x27f   :  { %v1447_v8 = vpop.f32.mrb[42].mxu1 }
 0x280   :  { %v1464_v44 = vadd.f32 %v1447_v8, %v1235_v49  ;;  %v1449_v60 = vpop.f32.mrb[43].mxu1  ;;  %v1732_v26 = vadd.f32 %v5091_v29, %v1463_v22 }
 0x282   :  { %v5155_v25 = vadd.f32 %v5100_v57, %v1464_v44 }
 0x285   :  { %v1452_v42 = vpop.f32.mrb[44].mxu1 }
 0x286   :  { %v1465_v12 = vadd.f32 %v1452_v42, %v1240_v51  ;;  %v1454_v20 = vpop.f32.mrb[45].mxu1 }
 0x287   :  { %v1455_v52 = vpop.f32.mrb[46].mxu1 }
 0x288   :  { %v1466_v5 = vadd.f32 %v1455_v52, %v1243_v34  ;;  %v1457_v39 = vpop.f32.mrb[47].mxu1  ;;  %v5158_v37 = vadd.f32 %v5138_v62, %v1465_v12 }
 0x28a   :  { %v5160_v1 = vadd.f32 %v1724_v33, %v1466_v5 }
 0x291   :  { %v1918_v61 = vpop.f32.mrb[48].mxu1 }
 0x292   :  { %v1949_v29 = vadd.f32 %v1918_v61, %v1728_v14  ;;  %v1920_v57 = vpop.f32.mrb[49].mxu1 }
 0x293   :  { %v1921_v0 = vpop.f32.mrb[50].mxu1 }
 0x294   :  { %v1964_v46 = vadd.f32 %v5165_v43, %v1949_v29  ;;  %v1950_v27 = vadd.f32 %v1921_v0, %v1729_v58  ;;  %v1923_v24 = vpop.f32.mrb[51].mxu1 }
 0x296   :  { %v1972_v35 = vmax.f32 %v1964_v46, 0.0  ;;  %v1965_v32 = vadd.f32 %v5165_v43, %v1950_v27 }
 0x298   :  { %v1980_v62 = vpack.c.bf16 %v1972_v35, %v1972_v35  ;;  %v1973_v7 = vmax.f32 %v1965_v32, 0.0 }
 0x299   :  { %v1926_v33 = vpop.f32.mrb[52].mxu1 }
 0x29a   :  { %v5169_v31 = vunpack.c.l.b16 %v1980_v62  ;;  %v1981_v50 = vpack.c.bf16 %v1973_v7, %v1973_v7  ;;  %v1951_v53 = vadd.f32 %v1926_v33, %v1730_v18  ;;  %v1928_v9 = vpop.f32.mrb[53].mxu1 }
 0x29b   :  { %v1929_v11 = vpop.f32.mrb[54].mxu1 }
 0x29c   :  { %v5171_v16 = vunpack.c.l.b16 %v1981_v50  ;;  %v1966_v30 = vadd.f32 %v5165_v43, %v1951_v53  ;;  %v1952_v10 = vadd.f32 %v1929_v11, %v1731_v13  ;;  %v1931_v63 = vpop.f32.mrb[55].mxu1  ;;  %v2037_v56 = vrot.slane %v5169_v31, 1 }
 0x29d   :  { %v2269_v49 = vrot.slane %v5169_v31, 2  ;;  %v2391_v21 = vrot.slane %v5169_v31, 3  ;;  %v2513_v55 = vrot.slane %v5169_v31, 4  ;;  %v2635_v51 = vrot.slane %v5169_v31, 5 }
 0x29e   :  { %v1974_v59 = vmax.f32 %v1966_v30, 0.0  ;;  %v1967_v48 = vadd.f32 %v5165_v43, %v1952_v10  ;;  %v2039_v34 = vsel %vm2038_vm1, %v5171_v16, %v2037_v56  ;;  %v2148_v54 = vrot.slane %v5171_v16, 7 }
 0x29f   :  { %v2270_v15 = vrot.slane %v5171_v16, 1  ;;  %v2392_v17 = vrot.slane %v5171_v16, 2  ;;  %v2514_v6 = vrot.slane %v5171_v16, 3  ;;  %v2636_v41 = vrot.slane %v5171_v16, 4 }
 0x2a0   :  { %v1982_v28 = vpack.c.bf16 %v1974_v59, %v1974_v59  ;;  %v1975_v23 = vmax.f32 %v1967_v48, 0.0  ;;  %v2149_v14 = vsel %vm2038_vm1, %v2148_v54, %v5169_v31  ;;  %v2757_v22 = vrot.slane %v5169_v31, 6 }
 0x2a1   :  { %v1934_v58 = vpop.f32.mrb[56].mxu1  ;;  %v2271_v38 = vsel %vm2038_vm1, %v2270_v15, %v2269_v49  ;;  %v2393_v40 = vsel %vm2038_vm1, %v2392_v17, %v2391_v21  ;;  %v2515_v2 = vsel %vm2038_vm1, %v2514_v6, %v2513_v55  ;;  %v5193_v45 = vsel %vm2038_vm1, %v2636_v41, %v2635_v51 }
 0x2a2   :  { %v5195_v47 = vunpack.c.l.b16 %v1982_v28  ;;  %v1983_v36 = vpack.c.bf16 %v1975_v23, %v1975_v23  ;;  %v1953_v18 = vadd.f32 %v1934_v58, %v1732_v26  ;;  %v1936_v13 = vpop.f32.mrb[57].mxu1  ;;  %v2758_v4 = vrot.slane %v5171_v16, 5 }
 0x2a3   :  { %v1937_v3 = vpop.f32.mrb[58].mxu1  ;;  %v2880_v8 = vrot.slane %v5171_v16, 6 }
 0x2a4   :  { %v5200_v44 = vunpack.c.l.b16 %v1983_v36  ;;  %v1968_v60 = vadd.f32 %v5165_v43, %v1953_v18  ;;  %v1954_v42 = vadd.f32 %v1937_v3, %v5155_v25  ;;  %v1939_v12 = vpop.f32.mrb[59].mxu1  ;;  %v2040_v20 = vrot.slane %v5195_v47, 7 }
 0x2a5   :  { %v2150_v26 = vrot.slane %v5195_v47, 6  ;;  %v2272_v52 = vsel %vm2041_vm3, %v5195_v47, %v2271_v38  ;;  %v2394_v5 = vrot.slane %v5195_v47, 1  ;;  %v2516_v39 = vrot.slane %v5195_v47, 2 }
 0x2a6   :  { %v1976_v61 = vmax.f32 %v1968_v60, 0.0  ;;  %v1969_v29 = vadd.f32 %v5165_v43, %v1954_v42  ;;  %v2042_v57 = vsel %vm2041_vm3, %v2040_v20, %v2039_v34  ;;  %v2043_v25 = vrot.slane %v5200_v44, 6 }
 0x2a7   :  { %v2151_v0 = vsel %vm2041_vm3, %v2150_v26, %v2149_v14  ;;  %v2152_v46 = vrot.slane %v5200_v44, 5  ;;  %v2273_v27 = vrot.slane %v5200_v44, 7  ;;  %v2395_v24 = vsel %vm2041_vm3, %v2394_v5, %v2393_v40 }
 0x2a8   :  { %v1984_v35 = vpack.c.bf16 %v1976_v61, %v1976_v61  ;;  %v1977_v32 = vmax.f32 %v1969_v29, 0.0  ;;  %v2045_v62 = vsel %vm2044_vm4, %v2043_v25, %v2042_v57  ;;  %v2396_v7 = vsel %vm2044_vm4, %v5200_v44, %v2395_v24 }
 0x2a9   :  { %v1942_v33 = vpop.f32.mrb[60].mxu1  ;;  %v2153_v50 = vsel %vm2044_vm4, %v2152_v46, %v2151_v0  ;;  %v2274_v53 = vsel %vm2044_vm4, %v2273_v27, %v2272_v52  ;;  %v2517_v9 = vsel %vm2041_vm3, %v2516_v39, %v2515_v2  ;;  %v2518_v11 = vrot.slane %v5200_v44, 1 }
 0x2aa   :  { %v5224_v30 = vunpack.c.l.b16 %v1984_v35  ;;  %v1985_v10 = vpack.c.bf16 %v1977_v32, %v1977_v32  ;;  %v1955_v63 = vadd.f32 %v1942_v33, %v5158_v37  ;;  %v1944_v56 = vpop.f32.mrb[61].mxu1  ;;  %v2638_v49 = vrot.slane %v5195_v47, 3 }
 0x2ab   :  { %v1945_v21 = vpop.f32.mrb[62].mxu1  ;;  %v2519_v55 = vsel %vm2044_vm4, %v2518_v11, %v2517_v9  ;;  %v2640_v51 = vrot.slane %v5200_v44, 2  ;;  %v2759_v59 = vsel %vm2038_vm1, %v2758_v4, %v2757_v22  ;;  %v2760_v48 = vrot.slane %v5195_v47, 4 }
 0x2ac   :  { %v5232_v34 = vunpack.c.l.b16 %v1985_v10  ;;  %v1970_v54 = vadd.f32 %v5165_v43, %v1955_v63  ;;  %v1956_v15 = vadd.f32 %v1945_v21, %v5160_v1  ;;  %v1947_v17 = vpop.f32.mrb[63].mxu1  ;;  %v2046_v37 = vrot.slane %v5224_v30, 5  ;;  %v4110_v21 = vld [vmem:[%s5623_s5 + $0xc0] sm:$0xff]  }
 0x2ad   :  { %v2154_v6 = vrot.slane %v5224_v30, 4  ;;  %v2275_v41 = vrot.slane %v5224_v30, 6  ;;  %v2397_v28 = vrot.slane %v5224_v30, 7  ;;  %v2520_v23 = vsel %vm2047_vm5, %v5224_v30, %v2519_v55 }
 0x2ae   :  { %v1978_v14 = vmax.f32 %v1970_v54, 0.0  ;;  %v1971_v58 = vadd.f32 %v5165_v43, %v1956_v15  ;;  %v2048_v38 = vsel %vm2047_vm5, %v2046_v37, %v2045_v62  ;;  %v2049_v1 = vrot.slane %v5232_v34, 4 }
 0x2af   :  { %v2155_v40 = vsel %vm2047_vm5, %v2154_v6, %v2153_v50  ;;  %v2156_v2 = vrot.slane %v5232_v34, 3  ;;  %v2276_v36 = vsel %vm2047_vm5, %v2275_v41, %v2274_v53  ;;  %v2277_v18 = vrot.slane %v5232_v34, 5 }
 0x2b0   :  { %v1986_v13 = vpack.c.bf16 %v1978_v14, %v1978_v14  ;;  %v1979_v3 = vmax.f32 %v1971_v58, 0.0  ;;  %v2051_v22 = vsel %vm2050_vm6, %v2049_v1, %v2048_v38  ;;  %v2398_v4 = vsel %vm2047_vm5, %v2397_v28, %v2396_v7  ;;  %v4111_v14 = vld [vmem:[%s5623_s5 + $0x88] sm:$0xff]  }
 0x2b1   :  { %v2157_v43 = vsel %vm2050_vm6, %v2156_v2, %v2155_v40  ;;  %v2278_v60 = vsel %vm2050_vm6, %v2277_v18, %v2276_v36  ;;  %v2399_v42 = vrot.slane %v5232_v34, 6  ;;  %v2521_v12 = vrot.slane %v5232_v34, 7  ;;  %v4112_v58 = vld [vmem:[%s5623_s5 + $0xc8] sm:$0xff]  }
 0x2b2   :  { %v5255_v20 = vunpack.c.l.b16 %v1986_v13  ;;  %v1987_v26 = vpack.c.bf16 %v1979_v3, %v1979_v3  ;;  %v2639_v52 = vsel %vm2041_vm3, %v2638_v49, %v5193_v45  ;;  %v2642_v5 = vrot.slane %v5224_v30, 1  ;;  %v4109_v49 = vld [vmem:[%s5623_s5 + $0x80] sm:$0xff]  }
 0x2b3   :  { %v2400_v39 = vsel %vm2050_vm6, %v2399_v42, %v2398_v4  ;;  %v2522_v61 = vsel %vm2050_vm6, %v2521_v12, %v2520_v23  ;;  %v2641_v29 = vsel %vm2044_vm4, %v2640_v51, %v2639_v52  ;;  %v2761_v57 = vsel %vm2041_vm3, %v2760_v48, %v2759_v59  ;;  %v4116_v52 = vld [vmem:[%s5623_s5 + $0xd8] sm:$0xff]  }
 0x2b4   :  { %v5264_v25 = vunpack.c.l.b16 %v1987_v26  ;;  %v2052_v0 = vrot.slane %v5255_v20, 3  ;;  %v2158_v46 = vrot.slane %v5255_v20, 2  ;;  %v2279_v27 = vrot.slane %v5255_v20, 4 }
 0x2b5   :  { %v2401_v45 = vrot.slane %v5255_v20, 5  ;;  %v2523_v24 = vrot.slane %v5255_v20, 6  ;;  %v2643_v35 = vsel %vm2047_vm5, %v2642_v5, %v2641_v29  ;;  %v2645_v32 = vrot.slane %v5255_v20, 7  ;;  %v4119_v29 = vld [vmem:[%s5623_s5 + $0xa8] sm:$0xff]  }
 0x2b6   :  { %v2054_v62 = vsel %vm2053_vm7, %v2052_v0, %v2051_v22  ;;  %v2055_v7 = vrot.slane %v5264_v25, 2  ;;  %v2159_v33 = vsel %vm2053_vm7, %v2158_v46, %v2157_v43  ;;  %v2160_v50 = vrot.slane %v5264_v25, 1  ;;  %v4114_v43 = vld [vmem:[%s5623_s5 + $0xd0] sm:$0xff]   ;;  %v4123_v46 = vld [vmem:[%s5623_s5 + $0xb8] sm:$0xff]  }
 0x2b7   :  { %v2280_v53 = vsel %vm2053_vm7, %v2279_v27, %v2278_v60  ;;  %v2281_v9 = vrot.slane %v5264_v25, 3  ;;  %v2402_v11 = vsel %vm2053_vm7, %v2401_v45, %v2400_v39  ;;  %v2403_v10 = vrot.slane %v5264_v25, 4  ;;  %v4117_v39 = vld [vmem:[%s5623_s5 + $0xa0] sm:$0xff]   ;;  %v4122_v0 = vld [vmem:[%s5623_s5 + $0xf0] sm:$0xff]   ;;  %v4124_v27 = vld [vmem:[%s5623_s5 + $0xf8] sm:$0xff]  }
 0x2b8   :  { %v2057_v63 = vsel %vm2056_vm8, %v2055_v7, %v2054_v62  ;;  %v2161_v56 = vsel %vm2056_vm8, %v2160_v50, %v2159_v33  ;;  %v2524_v55 = vsel %vm2053_vm7, %v2523_v24, %v2522_v61  ;;  %v2525_v51 = vrot.slane %v5264_v25, 5  ;;  %v4118_v61 = vld [vmem:[%s5623_s5 + $0xe0] sm:$0xff]   ;;  %v4127_v62 = vld [vmem:[%s5623_s5 + $0x108] sm:$0xff]   ;;  %v4129_v33 = vld [vmem:[%s5623_s5 + $0x110] sm:$0xff]  }
 0x2b9   :  { %v2058_v59 = vpack.c.b16 %v2057_v63, %v2057_v63  ;;  %v2162_v48 = vpack.c.b16 %v2161_v56, %v2161_v56  ;;  %v5292_v54 = vsel %vm2056_vm8, %v2281_v9, %v2280_v53  ;;  %v5295_v15 = vsel %vm2056_vm8, %v2403_v10, %v2402_v11  ;;  %v4125_v45 = vld [vmem:[%s5623_s5 + $0x100] sm:$0xff]   ;;  %v4128_v7 = vld [vmem:[%s5623_s5 + $0x148] sm:$0xff]   ;;  %v4130_v50 = vld [vmem:[%s5623_s5 + $0x150] sm:$0xff]  }
 0x2ba   :  { %v5298_v17 = vsel %vm2056_vm8, %v2525_v51, %v2524_v55  ;;  %v2644_v37 = vsel %vm2050_vm6, %v5232_v34, %v2643_v35  ;;  %v2879_v6 = vrot.slane %v5169_v31, 7  ;;  %v2647_v28 = vrot.slane %v5264_v25, 6  ;;  %v4126_v24 = vld [vmem:[%s5623_s5 + $0x140] sm:$0xff]   ;;  %v4131_v53 = vld [vmem:[%s5623_s5 + $0x118] sm:$0xff]   ;;  %v4135_v63 = vld [vmem:[%s5623_s5 + $0x128] sm:$0xff]  }
 0x2bb   :  { %3803 = vmatmul.mubr.bf16.vlgmr.msra.gmra.mrb[64].mxu0 %v2058_v59  ;;  %3823 = vmatmul.mubr.bf16.vlgmr.msra.gmra.mrb[64].mxu1 %v2162_v48  ;;  %v2646_v41 = vsel %vm2053_vm7, %v2645_v32, %v2644_v37  ;;  %v2762_v23 = vrot.slane %v5200_v44, 3  ;;  %v2764_v31 = vrot.slane %v5224_v30, 2  ;;  %v2766_v38 = vrot.slane %v5232_v34, 1  ;;  %v4132_v9 = vld [vmem:[%s5623_s5 + $0x158] sm:$0xff]   ;;  %v4133_v11 = vld [vmem:[%s5623_s5 + $0x120] sm:$0xff]   ;;  %v4136_v56 = vld [vmem:[%s5623_s5 + $0x168] sm:$0xff]  }
 0x2bc   :  { %3827 = vmatpush3.bf16.msra.mxu0 %v4109_v49  ;;  %3847 = vmatpush3.bf16.msra.mxu1 %v4110_v21  ;;  %v2769_v1 = vrot.slane %v5264_v25, 7  ;;  %v2881_v40 = vsel %vm2038_vm1, %v2880_v8, %v2879_v6  ;;  %v5321_v2 = vsel %vm2056_vm8, %v2647_v28, %v2646_v41  ;;  %v2882_v18 = vrot.slane %v5195_v47, 5  ;;  %v4134_v10 = vld [vmem:[%s5623_s5 + $0x160] sm:$0xff]   ;;  %v4137_v49 = vld [vmem:[%s5623_s5 + $0x130] sm:$0xff]   ;;  %v4139_v55 = vld [vmem:[%s5623_s5 + $0x138] sm:$0xff]  }
 0x2bd   :  { %3828 = vmatprep.subr.bf16.mxu0 %v4172_v19  ;;  %3848 = vmatprep.subr.bf16.mxu1 %v4172_v19  ;;  %v2763_v36 = vsel %vm2044_vm4, %v2762_v23, %v2761_v57  ;;  %v2884_v13 = vrot.slane %v5200_v44, 4  ;;  %v2886_v8 = vrot.slane %v5224_v30, 3  ;;  %v2888_v3 = vrot.slane %v5232_v34, 2  ;;  %v4113_v44 = vld [vmem:[%s5623_s5 + $0x90] sm:$0xff]   ;;  %v4120_v57 = vld [vmem:[%s5623_s5 + $0xe8] sm:$0xff]   ;;  %v4140_v51 = vld [vmem:[%s5623_s5 + $0x178] sm:$0xff]  }
 0x2be   :  { %3842 = vmatprep.mubr.msk.bf16.mxu0 %vm4173_vm0, %v4172_v19  ;;  %3862 = vmatprep.mubr.msk.bf16.mxu1 %vm4173_vm0, %v4172_v19  ;;  %v2765_v16 = vsel %vm2047_vm5, %v2764_v31, %v2763_v36  ;;  %v2883_v4 = vsel %vm2041_vm3, %v2882_v18, %v2881_v40  ;;  %v2890_v47 = vrot.slane %v5255_v20, 1  ;;  %v2283_v35 = vpack.c.b16 %v5292_v54, %v5292_v54  ;;  %v4138_v21 = vld [vmem:[%s5623_s5 + $0x170] sm:$0xff]   ;;  %v4141_v59 = vld [vmem:[%s5623_s5 + $0x180] sm:$0xff]   ;;  %v4143_v37 = vld [vmem:[%s5623_s5 + $0x188] sm:$0xff]  }
 0x2bf   :  { %v2767_v22 = vsel %vm2050_vm6, %v2766_v38, %v2765_v16  ;;  %v2885_v34 = vsel %vm2044_vm4, %v2884_v13, %v2883_v4  ;;  %v2405_v32 = vpack.c.b16 %v5295_v15, %v5295_v15  ;;  %v4142_v48 = vld [vmem:[%s5623_s5 + $0x1c0] sm:$0xff]   ;;  %v2527_v54 = vpack.c.b16 %v5298_v17, %v5298_v17  ;;  %v4144_v6 = vld [vmem:[%s5623_s5 + $0x1c8] sm:$0xff]   ;;  %v4145_v17 = vld [vmem:[%s5623_s5 + $0x190] sm:$0xff]  }
 0x2c0   :  { %3829 = vmatpush3.bf16.msra.mxu0 %v4111_v14  ;;  %3849 = vmatpush3.bf16.msra.mxu1 %v4112_v58  ;;  %v2768_v30 = vsel %vm2053_vm7, %v5255_v20, %v2767_v22  ;;  %v2887_v42 = vsel %vm2047_vm5, %v2886_v8, %v2885_v34  ;;  %v4115_v20 = vld [vmem:[%s5623_s5 + $0x98] sm:$0xff]   ;;  %v2649_v15 = vpack.c.b16 %v5321_v2, %v5321_v2  ;;  %v4146_v41 = vld [vmem:[%s5623_s5 + $0x1d0] sm:$0xff]   ;;  %v4149_v14 = vld [vmem:[%s5623_s5 + $0x1a0] sm:$0xff]  }
 0x2c1   :  { %3830 = vmatprep.subr.bf16.mxu0 %v4172_v19  ;;  %3850 = vmatprep.subr.bf16.mxu1 %v4172_v19  ;;  %v5348_v60 = vsel %vm2056_vm8, %v2769_v1, %v2768_v30  ;;  %v2889_v12 = vsel %vm2050_vm6, %v2888_v3, %v2887_v42  ;;  %v4147_v28 = vld [vmem:[%s5623_s5 + $0x198] sm:$0xff]   ;;  %v4150_v58 = vld [vmem:[%s5623_s5 + $0x1e0] sm:$0xff]   ;;  %v4151_v31 = vld [vmem:[%s5623_s5 + $0x1a8] sm:$0xff]  }
 0x2c2   :  { %v2891_v26 = vsel %vm2053_vm7, %v2890_v47, %v2889_v12  ;;  %v4148_v23 = vld [vmem:[%s5623_s5 + $0x1d8] sm:$0xff]   ;;  %v4152_v38 = vld [vmem:[%s5623_s5 + $0x1e8] sm:$0xff]   ;;  %v4153_v1 = vld [vmem:[%s5623_s5 + $0x1b0] sm:$0xff]   ;;  %v2771_v18 = vpack.c.b16 %v5348_v60, %v5348_v60 }
 0x2c3   :  { %v5361_v5 = vsel %vm2056_vm8, %v5264_v25, %v2891_v26  ;;  %v4121_v25 = vld [vmem:[%s5623_s5 + $0xb0] sm:$0xff]   ;;  %v4155_v2 = vld [vmem:[%s5623_s5 + $0x1b8] sm:$0xff]   ;;  %v4157_v16 = vld [vmem:[%s5625_s7] sm:$0xff]  }
 0x2c4   :  { %3831 = vmatpush3.bf16.msra.mxu0 %v4113_v44  ;;  %3851 = vmatpush3.bf16.msra.mxu1 %v4114_v43  ;;  %v4154_v40 = vld [vmem:[%s5623_s5 + $0x1f0] sm:$0xff]   ;;  %v4156_v36 = vld [vmem:[%s5623_s5 + $0x1f8] sm:$0xff]   ;;  %v2893_v13 = vpack.c.b16 %v5361_v5, %v5361_v5  ;;  %v4158_v8 = vld [vmem:[%s5625_s7 + $0x8] sm:$0xff]  }
 0x2c5   :  { %3832 = vmatprep.subr.bf16.mxu0 %v4172_v19  ;;  %3852 = vmatprep.subr.bf16.mxu1 %v4172_v19  ;;  %v4159_v3 = vld [vmem:[%s5625_s7 + $0x10] sm:$0xff]   ;;  %v4160_v22 = vld [vmem:[%s5625_s7 + $0x18] sm:$0xff]   ;;  %v4161_v4 = vld [vmem:[%s5625_s7 + $0x20] sm:$0xff]  }
 0x2c6   :  { %v4162_v47 = vld [vmem:[%s5625_s7 + $0x28] sm:$0xff]   ;;  %v4163_v44 = vld [vmem:[%s5625_s7 + $0x30] sm:$0xff]   ;;  %v4164_v43 = vld [vmem:[%s5625_s7 + $0x38] ss:$0 sps:$4 sm:$0xff]  }
 0x2c7   :  { %v4165_v30 = vld [vmem:[%s5626_s9] sm:$0xff]   ;;  %v4166_v34 = vld [vmem:[%s5626_s9 + $0x8] sm:$0xff]   ;;  %v3066_v60 = vsel %vm566_vm2, %v4164_v43, 0  ;;  %v4167_v42 = vld [vmem:[%s5626_s9 + $0x10] sm:$0xff]   ;;  %vm3061_vm2 = vcmask 982016  }
 0x2c8   :  { %3833 = vmatpush3.bf16.msra.mxu0 %v4115_v20  ;;  %3853 = vmatpush3.bf16.msra.mxu1 %v4116_v52  ;;  %v4168_v12 = vld [vmem:[%s5626_s9 + $0x18] sm:$0xff]  }
 0x2c9   :  { %3834 = vmatprep.subr.bf16.mxu0 %v4172_v19  ;;  %3854 = vmatprep.subr.bf16.mxu1 %v4172_v19 }
 0x2cc   :  { %3835 = vmatpush3.bf16.msra.mxu0 %v4117_v39  ;;  %3855 = vmatpush3.bf16.msra.mxu1 %v4118_v61 }
 0x2cd   :  { %3836 = vmatprep.subr.bf16.mxu0 %v4172_v19  ;;  %3856 = vmatprep.subr.bf16.mxu1 %v4172_v19 }
 0x2d0   :  { %3837 = vmatpush3.bf16.msra.mxu0 %v4119_v29  ;;  %3857 = vmatpush3.bf16.msra.mxu1 %v4120_v57 }
 0x2d1   :  { %3838 = vmatprep.subr.bf16.mxu0 %v4172_v19  ;;  %3858 = vmatprep.subr.bf16.mxu1 %v4172_v19 }
 0x2d4   :  { %3839 = vmatpush3.bf16.msra.mxu0 %v4121_v25  ;;  %3859 = vmatpush3.bf16.msra.mxu1 %v4122_v0 }
 0x2d5   :  { %3840 = vmatprep.subr.bf16.mxu0 %v4172_v19  ;;  %3860 = vmatprep.subr.bf16.mxu1 %v4172_v19 }
 0x2d8   :  { %3841 = vmatpush3.bf16.msra.mxu0 %v4123_v46  ;;  %3861 = vmatpush3.bf16.msra.mxu1 %v4124_v27 }
 0x2d9   :  { %3866 = vmatprep.subr.bf16.mxu0 %v4172_v19  ;;  %3886 = vmatprep.subr.bf16.mxu1 %v4172_v19 }
 0x2db   :  { %3843 = vmatmul.mubr.bf16.vlgmr.msra.gmra.mrb[68].mxu0 %v2283_v35  ;;  %3863 = vmatmul.mubr.bf16.vlgmr.msra.gmra.mrb[68].mxu1 %v2405_v32 }
 0x2dc   :  { %3867 = vmatpush3.bf16.msra.mxu0 %v4125_v45  ;;  %3887 = vmatpush3.bf16.msra.mxu1 %v4126_v24 }
 0x2dd   :  { %3868 = vmatprep.subr.bf16.mxu0 %v4172_v19  ;;  %3888 = vmatprep.subr.bf16.mxu1 %v4172_v19 }
 0x2de   :  { %3882 = vmatprep.mubr.msk.bf16.mxu0 %vm4173_vm0, %v4172_v19  ;;  %3902 = vmatprep.mubr.msk.bf16.mxu1 %vm4173_vm0, %v4172_v19 }
 0x2e0   :  { %3869 = vmatpush3.bf16.msra.mxu0 %v4127_v62  ;;  %3889 = vmatpush3.bf16.msra.mxu1 %v4128_v7 }
 0x2e1   :  { %3870 = vmatprep.subr.bf16.mxu0 %v4172_v19  ;;  %3890 = vmatprep.subr.bf16.mxu1 %v4172_v19 }
 0x2e4   :  { %3871 = vmatpush3.bf16.msra.mxu0 %v4129_v33  ;;  %3891 = vmatpush3.bf16.msra.mxu1 %v4130_v50 }
 0x2e5   :  { %3872 = vmatprep.subr.bf16.mxu0 %v4172_v19  ;;  %3892 = vmatprep.subr.bf16.mxu1 %v4172_v19 }
 0x2e8   :  { %3873 = vmatpush3.bf16.msra.mxu0 %v4131_v53  ;;  %3893 = vmatpush3.bf16.msra.mxu1 %v4132_v9 }
 0x2e9   :  { %3874 = vmatprep.subr.bf16.mxu0 %v4172_v19  ;;  %3894 = vmatprep.subr.bf16.mxu1 %v4172_v19 }
 0x2ec   :  { %3875 = vmatpush3.bf16.msra.mxu0 %v4133_v11  ;;  %3895 = vmatpush3.bf16.msra.mxu1 %v4134_v10 }
 0x2ed   :  { %3876 = vmatprep.subr.bf16.mxu0 %v4172_v19  ;;  %3896 = vmatprep.subr.bf16.mxu1 %v4172_v19 }
 0x2f0   :  { %3877 = vmatpush3.bf16.msra.mxu0 %v4135_v63  ;;  %3897 = vmatpush3.bf16.msra.mxu1 %v4136_v56 }
 0x2f1   :  { %3878 = vmatprep.subr.bf16.mxu0 %v4172_v19  ;;  %3898 = vmatprep.subr.bf16.mxu1 %v4172_v19 }
 0x2f4   :  { %3879 = vmatpush3.bf16.msra.mxu0 %v4137_v49  ;;  %3899 = vmatpush3.bf16.msra.mxu1 %v4138_v21 }
 0x2f5   :  { %3880 = vmatprep.subr.bf16.mxu0 %v4172_v19  ;;  %3900 = vmatprep.subr.bf16.mxu1 %v4172_v19 }
 0x2f8   :  { %3881 = vmatpush3.bf16.msra.mxu0 %v4139_v55  ;;  %3901 = vmatpush3.bf16.msra.mxu1 %v4140_v51 }
 0x2f9   :  { %3906 = vmatprep.subr.bf16.mxu0 %v4172_v19  ;;  %3926 = vmatprep.subr.bf16.mxu1 %v4172_v19 }
 0x2fb   :  { %3883 = vmatmul.mubr.bf16.vlgmr.msra.gmra.mrb[72].mxu0 %v2527_v54  ;;  %3903 = vmatmul.mubr.bf16.vlgmr.msra.gmra.mrb[72].mxu1 %v2649_v15 }
 0x2fc   :  { %3907 = vmatpush3.bf16.msra.mxu0 %v4141_v59  ;;  %3927 = vmatpush3.bf16.msra.mxu1 %v4142_v48 }
 0x2fd   :  { %3908 = vmatprep.subr.bf16.mxu0 %v4172_v19  ;;  %3928 = vmatprep.subr.bf16.mxu1 %v4172_v19 }
 0x2fe   :  { %3922 = vmatprep.mubr.msk.bf16.mxu0 %vm4173_vm0, %v4172_v19  ;;  %3942 = vmatprep.mubr.msk.bf16.mxu1 %vm4173_vm0, %v4172_v19 }
 0x300   :  { %3909 = vmatpush3.bf16.msra.mxu0 %v4143_v37  ;;  %3929 = vmatpush3.bf16.msra.mxu1 %v4144_v6  ;;  %v3655_v37 = vld [vmem:[%s5627_s6] ss:$0 sm:$0xff] }
 0x301   :  { %3910 = vmatprep.subr.bf16.mxu0 %v4172_v19  ;;  %3930 = vmatprep.subr.bf16.mxu1 %v4172_v19 }
 0x304   :  { %3911 = vmatpush3.bf16.msra.mxu0 %v4145_v17  ;;  %3931 = vmatpush3.bf16.msra.mxu1 %v4146_v41 }
 0x305   :  { %3912 = vmatprep.subr.bf16.mxu0 %v4172_v19  ;;  %3932 = vmatprep.subr.bf16.mxu1 %v4172_v19 }
 0x308   :  { %3913 = vmatpush3.bf16.msra.mxu0 %v4147_v28  ;;  %3933 = vmatpush3.bf16.msra.mxu1 %v4148_v23 }
 0x309   :  { %3914 = vmatprep.subr.bf16.mxu0 %v4172_v19  ;;  %3934 = vmatprep.subr.bf16.mxu1 %v4172_v19 }
 0x30c   :  { %3915 = vmatpush3.bf16.msra.mxu0 %v4149_v14  ;;  %3935 = vmatpush3.bf16.msra.mxu1 %v4150_v58 }
 0x30d   :  { %3916 = vmatprep.subr.bf16.mxu0 %v4172_v19  ;;  %3936 = vmatprep.subr.bf16.mxu1 %v4172_v19 }
 0x310   :  { %3917 = vmatpush3.bf16.msra.mxu0 %v4151_v31  ;;  %3937 = vmatpush3.bf16.msra.mxu1 %v4152_v38  ;;  %v4169_v38 = vld [vmem:[%s5626_s9 + $0x20] sm:$0xff]  }
 0x311   :  { %3918 = vmatprep.subr.bf16.mxu0 %v4172_v19  ;;  %3938 = vmatprep.subr.bf16.mxu1 %v4172_v19 }
 0x314   :  { %3919 = vmatpush3.bf16.msra.mxu0 %v4153_v1  ;;  %3939 = vmatpush3.bf16.msra.mxu1 %v4154_v40  ;;  %v4170_v1 = vld [vmem:[%s5626_s9 + $0x28] ss:$0 sps:$4 sm:$0x33]  }
 0x315   :  { %3920 = vmatprep.subr.bf16.mxu0 %v4172_v19  ;;  %3940 = vmatprep.subr.bf16.mxu1 %v4172_v19  ;;  %v3167_v40 = vsel %vm1736_vm13, %v4170_v1, 0 }
 0x318   :  { %3921 = vmatpush3.bf16.msra.mxu0 %v4155_v2  ;;  %3941 = vmatpush3.bf16.msra.mxu1 %v4156_v36  ;;  %v3656_v2 = vld [vmem:[%s5628_s8] ss:$0 sm:$0xff] }
 0x319   :  { %3946 = vmatprep.subr.bf16.mxu0 %v4172_v19  ;;  %3966 = vmatprep.subr.bf16.mxu1 %v4172_v19 }
 0x31b   :  { %3923 = vmatmul.mubr.bf16.vlgmr.msra.gmra.mrb[76].mxu0 %v2771_v18  ;;  %3943 = vmatmul.mubr.bf16.vlgmr.msra.gmra.mrb[76].mxu1 %v2893_v13 }
 0x31c   :  { %3962 = vmatprep.mubr.msk.bf16.mxu0 %vm4173_vm0, %v4172_v19  ;;  %3978 = vmatprep.mubr.msk.bf16.mxu1 %vm4173_vm0, %v4172_v19 }
 0x31d   :  { %3947 = vmatpush3.bf16.msra.mxu0 %v4157_v16  ;;  %3967 = vmatpush3.bf16.msra.mxu1 %v4165_v30 }
 0x31e   :  { %3948 = vmatprep.subr.bf16.mxu0 %v4172_v19  ;;  %3968 = vmatprep.subr.bf16.mxu1 %v4172_v19 }
 0x321   :  { %3949 = vmatpush3.bf16.msra.mxu0 %v4158_v8  ;;  %3969 = vmatpush3.bf16.msra.mxu1 %v4166_v34 }
 0x322   :  { %3950 = vmatprep.subr.bf16.mxu0 %v4172_v19  ;;  %3970 = vmatprep.subr.bf16.mxu1 %v4172_v19 }
 0x325   :  { %3951 = vmatpush3.bf16.msra.mxu0 %v4159_v3  ;;  %3971 = vmatpush3.bf16.msra.mxu1 %v4167_v42 }
 0x326   :  { %3952 = vmatprep.subr.bf16.mxu0 %v4172_v19  ;;  %3972 = vmatprep.subr.bf16.mxu1 %v4172_v19 }
 0x329   :  { %3953 = vmatpush3.bf16.msra.mxu0 %v4160_v22  ;;  %3973 = vmatpush3.bf16.msra.mxu1 %v4168_v12 }
 0x32a   :  { %3954 = vmatprep.subr.bf16.mxu0 %v4172_v19  ;;  %3974 = vmatprep.subr.bf16.mxu1 %v4172_v19 }
 0x32d   :  { %3955 = vmatpush3.bf16.msra.mxu0 %v4161_v4  ;;  %3975 = vmatpush3.bf16.msra.mxu1 %v4169_v38 }
 0x32e   :  { %3956 = vmatprep.subr.bf16.mxu0 %v4172_v19  ;;  %3976 = vmatprep.subr.bf16.mxu1 %v4172_v19 }
 0x331   :  { %3957 = vmatpush3.bf16.msra.mxu0 %v4162_v47  ;;  %3977 = vmatpush3.bf16.msra.mxu1 %v3167_v40 }
 0x332   :  { %3958 = vmatprep.subr.bf16.mxu0 %v4172_v19 }
 0x335   :  { %3959 = vmatpush3.bf16.msra.mxu0 %v4163_v44 }
 0x336   :  { %3960 = vmatprep.subr.bf16.mxu0 %v4172_v19  ;;  %v3666_v19 = vld [vmem:[%s5629_s10] ss:$0 sm:$0xff] }
 0x339   :  { %3961 = vmatpush3.bf16.msra.mxu0 %v3066_v60 }
 0x38e   :  { %v2142_v26 = vpop.f32.mrb[64].mxu0  ;;  %v2246_v20 = vpop.f32.mrb[64].mxu1 }
 0x38f   :  { %v2247_v52 = vadd.f32 %v2246_v20, %v2142_v26  ;;  %v3804_v5 = vpop.f32.mrb[65].mxu0  ;;  %v3824_v39 = vpop.f32.mrb[65].mxu1 }
 0x390   :  { %v2145_v61 = vpop.f32.mrb[66].mxu0  ;;  %v2249_v29 = vpop.f32.mrb[66].mxu1 }
 0x391   :  { %v3805_v57 = vpop.f32.mrb[67].mxu0  ;;  %v3825_v25 = vpop.f32.mrb[67].mxu1 }
 0x3ae   :  { %v2367_v0 = vpop.f32.mrb[68].mxu0  ;;  %v2489_v46 = vpop.f32.mrb[68].mxu1 }
 0x3af   :  { %v2373_v27 = vadd.f32 %v2367_v0, %v2247_v52  ;;  %v3844_v45 = vpop.f32.mrb[69].mxu0  ;;  %v3864_v24 = vpop.f32.mrb[69].mxu1 }
 0x3b0   :  { %v2370_v35 = vpop.f32.mrb[70].mxu0  ;;  %v2492_v32 = vpop.f32.mrb[70].mxu1 }
 0x3b1   :  { %v2495_v62 = vadd.f32 %v2489_v46, %v2373_v27  ;;  %v3845_v7 = vpop.f32.mrb[71].mxu0  ;;  %v3865_v33 = vpop.f32.mrb[71].mxu1 }
 0x3ce   :  { %v2611_v50 = vpop.f32.mrb[72].mxu0  ;;  %v2733_v53 = vpop.f32.mrb[72].mxu1 }
 0x3cf   :  { %v2617_v9 = vadd.f32 %v2611_v50, %v2495_v62  ;;  %v3884_v11 = vpop.f32.mrb[73].mxu0  ;;  %v3904_v10 = vpop.f32.mrb[73].mxu1 }
 0x3d0   :  { %v2614_v63 = vpop.f32.mrb[74].mxu0  ;;  %v2736_v56 = vpop.f32.mrb[74].mxu1 }
 0x3d1   :  { %v2739_v49 = vadd.f32 %v2733_v53, %v2617_v9  ;;  %v3885_v21 = vpop.f32.mrb[75].mxu0  ;;  %v3905_v55 = vpop.f32.mrb[75].mxu1 }
 0x3ee   :  { %v2855_v51 = vpop.f32.mrb[76].mxu0  ;;  %v2977_v59 = vpop.f32.mrb[76].mxu1 }
 0x3ef   :  { %v2861_v48 = vadd.f32 %v2855_v51, %v2739_v49  ;;  %v3924_v54 = vpop.f32.mrb[77].mxu0  ;;  %v3944_v15 = vpop.f32.mrb[77].mxu1 }
 0x3f0   :  { %v2858_v6 = vpop.f32.mrb[78].mxu0  ;;  %v2980_v17 = vpop.f32.mrb[78].mxu1 }
 0x3f1   :  { %v2983_v41 = vadd.f32 %v2977_v59, %v2861_v48  ;;  %v3925_v28 = vpop.f32.mrb[79].mxu0  ;;  %v3945_v23 = vpop.f32.mrb[79].mxu1 }
 0x3f3   :  { %v2991_v14 = vadd.f32 %v3655_v37, %v2983_v41 }
 0x3f5   :  { %v2992_v58 = vmax.f32 %v2991_v14, 0.0 }
 0x3f7   :  { %v2993_v31 = vpack.c.bf16 %v2992_v58, %v2992_v58 }
 0x3f9   :  { %3963 = vmatmul.mubr.msk.bf16.vlgmr.msra.gmra.mrb[80].mxu0 %vm3061_vm2, %v2993_v31 }
 0x4cc   :  { %v3102_v36 = vpop.f32.mrb[80].mxu0 }
 0x4cd   :  { %v3103_v18 = vadd.f32 %v3656_v2, %v3102_v36  ;;  %v3964_v13 = vpop.f32.mrb[81].mxu0 }
 0x4ce   :  { %v3105_v16 = vpop.f32.mrb[82].mxu0 }
 0x4cf   :  { %v3108_v8 = vmax.f32 %v3103_v18, 0.0  ;;  %v3965_v3 = vpop.f32.mrb[83].mxu0 }
 0x4d1   :  { %v3109_v22 = vpack.c.bf16 %v3108_v8, %v3108_v8 }
 0x4d3   :  { %3979 = vmatmul.mubr.msk.bf16.vlgmr.msra.gmra.mrb[80].mxu1 %vm3161_vm9, %v3109_v22 }
 0x5a6   :  { %v3203_v4 = vpop.f32.mrb[80].mxu1 }
 0x5a7   :  { %v3204_v47 = vadd.f32 %v3666_v19, %v3203_v4  ;;  %v3980_v44 = vpop.f32.mrb[81].mxu1 }
 0x5a8   :  { %v3206_v43 = vpop.f32.mrb[82].mxu1 }
 0x5a9   :  { %3209 = vst [vmem:[%s5630_s11] sm:$0xff] %v3204_v47  ;;  %v3981_v30 = vpop.f32.mrb[83].mxu1 }

</bundles_post_ra>
